<compile_context>
chip_gen: v7x
topology: tpu7x:2x2x1
jax: 0.10.0
libtpu: 0.0.40
codegen_flags: <defaults>
</compile_context>

<pallas_src>
import functools

import numpy as np
import jax
import jax.numpy as jnp
from jax.experimental import pallas as pl
from jax.experimental.pallas import tpu as pltpu

_LANE = 128


def _round_up(x, m):
    return (x + m - 1) // m * m


def _lowbias32(z):
    # Good-avalanche 32-bit integer hash (lowbias32), uint32 arithmetic.
    z = z ^ (z >> 16)
    z = z * jnp.uint32(0x7FEB352D)
    z = z ^ (z >> 15)
    z = z * jnp.uint32(0x846CA68B)
    z = z ^ (z >> 16)
    return z


def _dense_aspp_kernel(
    seed_ref,    # scalar-prefetch (SMEM): (1,) int32 dropout seed
    x_ref,       # (1, TH, W, CK)          input row tile, one Cin chunk
    w1_ref,      # (CK, C1p)       bf16    1x1 conv weight chunk (BN scale folded)
    shift_ref,   # (1, C1p)        f32     fused BN shift
    w2_ref,      # (9, C1p, C2p)   bf16    3x3 dilated conv weight, tap-major
    out_ref,     # (1, TH, W, C2)  f32     output row tile (real channels only)
    pad_ref,     # VMEM (H+2d, Wp, C1p) bf16   zero-halo h1 scratch (persistent)
    acc_ref,     # VMEM (TH*W, C1p) f32        conv1 Cin-chunk accumulator
        *, H, W, TH, R, CK, KC, C1p, C2p, C2, d, dl, Wp, p):
    n = pl.program_id(0)
    r = pl.program_id(1)   # row-tile step, 0..R (step R only drains the lag)
    k = pl.program_id(2)   # Cin chunk, 0..KC-1

    # ---- zero the halo frame once per batch (image-edge padding only) ----
    @pl.when(jnp.logical_and(r == 0, k == 0))
    def _():
        pad_ref[0:d, :, :] = jnp.zeros((d, Wp, C1p), jnp.bfloat16)
        pad_ref[d + H:2 * d + H, :, :] = jnp.zeros((d, Wp, C1p), jnp.bfloat16)
        pad_ref[d:d + H, 0:dl, :] = jnp.zeros((H, dl, C1p), jnp.bfloat16)
        pad_ref[d:d + H, dl + W:Wp, :] = jnp.zeros(
            (H, Wp - dl - W, C1p), jnp.bfloat16)

    # ---- conv1 (1x1, BN scale pre-folded): accumulate this Cin chunk ----
    @pl.when(r < R)
    def _():
        x = x_ref[0].reshape(TH * W, CK).astype(jnp.bfloat16)
        part = jnp.dot(x, w1_ref[...], preferred_element_type=jnp.float32)
        if KC == 1:
            acc_ref[...] = part
        else:
            acc_ref[...] = jnp.where(k == 0, part, acc_ref[...] + part)

    # ---- last Cin chunk: BN shift + ReLU, write bf16 tile into halo scratch ----
    @pl.when(jnp.logical_and(r < R, k == KC - 1))
    def _():
        h1 = jnp.maximum(acc_ref[...] + shift_ref[...], 0.0).astype(jnp.bfloat16)
        pad_ref[pl.ds(d + r * TH, TH), dl:dl + W, :] = h1.reshape(TH, W, C1p)

    # ---- conv2 (3x3 dilated: 9 accumulating dots) + ReLU + dropout + store,
    #      one row tile behind so the bottom halo is already materialized ----
    @pl.when(jnp.logical_and(r >= 1, k == KC - 1))
    def _():
        ro = r - 1
        rbase = ro * TH
        y = jnp.zeros((TH * W, C2p), jnp.float32)
        for t in range(9):
            ky, kx = divmod(t, 3)
            cs = (dl - d) + kx * d          # static column offset of this tap
            tap = pad_ref[pl.ds(rbase + ky * d, TH), cs:cs + W, :]
            y = y + jnp.dot(tap.reshape(TH * W, C1p), w2_ref[t],
                            preferred_element_type=jnp.float32)
        y = jnp.maximum(y, 0.0)

        if p > 0.0:
            # F.dropout default training=True: drop with prob p, keep * 1/(1-p).
            mix = ((jax.lax.broadcasted_iota(jnp.int32, (TH * W, C2p), 0) * C2p
                    + jax.lax.broadcasted_iota(jnp.int32, (TH * W, C2p), 1)
                    ).astype(jnp.uint32)
                   ^ (seed_ref[0].astype(jnp.uint32) * jnp.uint32(0x9E3779B9))
                   ^ (n.astype(jnp.uint32) * jnp.uint32(0x85EBCA6B))
                   ^ (ro.astype(jnp.uint32) * jnp.uint32(0xC2B2AE35)))
            z = _lowbias32(mix)
            thr = jnp.uint32(min(int(p * 4294967296.0), 0xFFFFFFFF))
            y = jnp.where(z >= thr, y * jnp.float32(1.0 / (1.0 - p)), 0.0)

        out_ref[0] = y[:, :C2].reshape(TH, W, C2).astype(out_ref.dtype)


def _pick_row_tile(H, d, row_tile):
    th = row_tile if row_tile is not None else 16
    th = max(int(th), d)     # lag-by-one conv2 needs its halo within one tile
    th = min(th, H)
    assert th >= d, "row tile must be >= dilation (requires dilation <= H)"
    while H % th != 0:       # tile must divide H exactly
        th += 1
    return th


def _pick_cin_tile(Cin, cin_tile):
    if cin_tile is None:
        cin_tile = 512       # review: 256-512 Cin chunks keep blocks v7x-sized
    ck = min(int(cin_tile), Cin)
    # A chunk must divide Cin and be lane-tileable (multiple of 128) unless it
    # covers all of Cin.
    if ck >= Cin or Cin % ck != 0 or ck % _LANE != 0:
        ck = Cin
    return ck


def dense_aspp_block(x_nhwc, w1, bn_scale, bn_shift, w2, *, dilation, drop_out,
                     seed=0, row_tile=None, cin_tile=None):
    """Fused DenseAsppBlock forward (channels-last NHWC).

    x_nhwc:   (N, H, W, Cin) f32 or bf16
    w1:       (Cin, C1)       1x1 conv weight
    bn_scale: (C1,)           gamma / sqrt(running_var + eps)
    bn_shift: (C1,)           beta - running_mean * bn_scale
    w2:       (3, 3, C1, C2)  3x3 dilated conv weight (HWIO)
    Returns (N, H, W, C2) f32.
    """
    N, H, W, Cin = x_nhwc.shape
    C1 = w1.shape[1]
    C2 = w2.shape[3]
    d = int(dilation)
    assert 1 <= d <= H, "dilation must satisfy 1 <= d <= H"
    C1p = _round_up(C1, _LANE)
    C2p = _round_up(C2, _LANE)

    TH = _pick_row_tile(H, d, row_tile)
    R = H // TH
    CK = _pick_cin_tile(Cin, cin_tile)
    KC = Cin // CK

    # Sublane-aligned (bf16 packs 16 sublanes/vreg) left halo for the scratch.
    dl = _round_up(d, 16)
    Wp = dl + W + _round_up(d, 16)

    # --- weight prep (tiny; done once, outside the kernel) ---
    w1_eff = w1.astype(jnp.float32) * bn_scale.astype(jnp.float32)[None, :]
    w1p = jnp.zeros((Cin, C1p), jnp.bfloat16).at[:, :C1].set(
        w1_eff.astype(jnp.bfloat16))
    shift_p = jnp.zeros((1, C1p), jnp.float32).at[:, :C1].set(
        bn_shift.reshape(1, C1).astype(jnp.float32))
    w2p = jnp.zeros((9, C1p, C2p), jnp.bfloat16).at[:, :C1, :C2].set(
        w2.reshape(9, C1, C2).astype(jnp.bfloat16))

    kernel = functools.partial(
        _dense_aspp_kernel, H=H, W=W, TH=TH, R=R, CK=CK, KC=KC,
        C1p=C1p, C2p=C2p, C2=C2, d=d, dl=dl, Wp=Wp, p=float(drop_out))

    def _k_eff(r, k):
        # The drain step (r == R) reuses the previous x / w1 block index so no
        # fresh (wasted) DMA is issued for it.
        return jnp.where(r >= R, KC - 1, k)

    grid_spec = pltpu.PrefetchScalarGridSpec(
        num_scalar_prefetch=1,
        grid=(N, R + 1, KC),
        in_specs=[
            pl.BlockSpec((1, TH, W, CK),
                         lambda n, r, k, s: (n, jnp.minimum(r, R - 1), 0,
                                             _k_eff(r, k))),
            pl.BlockSpec((CK, C1p), lambda n, r, k, s: (_k_eff(r, k), 0)),
            pl.BlockSpec((1, C1p), lambda n, r, k, s: (0, 0)),
            pl.BlockSpec((9, C1p, C2p), lambda n, r, k, s: (0, 0, 0)),
        ],
        out_specs=pl.BlockSpec((1, TH, W, C2),
                               lambda n, r, k, s: (n, jnp.maximum(r - 1, 0),
                                                   0, 0)),
        scratch_shapes=[
            pltpu.VMEM((H + 2 * d, Wp, C1p), jnp.bfloat16),
            pltpu.VMEM((TH * W, C1p), jnp.float32),
        ],
    )

    # Explicit scoped-VMEM budget: 2x double-buffered blocks + scratch + slack.
    def _nbytes(shape, dtype):
        return int(np.prod(shape)) * jnp.dtype(dtype).itemsize
    vmem_est = (2 * _nbytes((1, TH, W, CK), x_nhwc.dtype)
                + 2 * _nbytes((1, TH, W, C2), jnp.float32)
                + 2 * _nbytes((CK, C1p), jnp.bfloat16)
                + 2 * _nbytes((1, C1p), jnp.float32)
                + 2 * _nbytes((9, C1p, C2p), jnp.bfloat16)
                + _nbytes((H + 2 * d, Wp, C1p), jnp.bfloat16)
                + _nbytes((TH * W, C1p), jnp.float32))
    vmem_limit = min(max(2 * vmem_est, 32 << 20), 96 << 20)

    out = pl.pallas_call(
        kernel,
        out_shape=jax.ShapeDtypeStruct((N, H, W, C2), jnp.float32),
        grid_spec=grid_spec,
        compiler_params=pltpu.CompilerParams(
            dimension_semantics=("parallel", "arbitrary", "arbitrary"),
            vmem_limit_bytes=int(vmem_limit)),
    )(jnp.array([seed], jnp.int32), x_nhwc, w1p, shift_p, w2p)
    return out


def dense_aspp_block_nchw(x_nchw, *args, **kwargs):
    # Compatibility shim for the PyTorch NCHW calling convention.  Prefer the
    # NHWC entry point: these two transposes add ~2 extra HBM passes.
    out = dense_aspp_block(jnp.transpose(x_nchw, (0, 2, 3, 1)), *args, **kwargs)
    return jnp.transpose(out, (0, 3, 1, 2))


def reference_no_dropout(x_nhwc, w1, bn_scale, bn_shift, w2, *, dilation):
    """Pure-JAX reference for everything up to (and excluding) dropout.

    Mirrors the kernel numerics: bn_scale folded into w1, operands rounded to
    bf16, accumulation in f32.
    """
    f32 = jnp.float32
    hi = jax.lax.Precision.HIGHEST
    xb = x_nhwc.astype(jnp.bfloat16).astype(f32)
    w1_eff = (w1.astype(f32) * bn_scale.astype(f32)[None, :]
              ).astype(jnp.bfloat16).astype(f32)
    h1 = jnp.einsum('nhwc,cd->nhwd', xb, w1_eff, precision=hi)
    h1 = h1 + bn_shift.reshape(1, 1, 1, -1).astype(f32)
    h1 = jax.nn.relu(h1)
    h1b = h1.astype(jnp.bfloat16).astype(f32)
    w2b = w2.astype(jnp.bfloat16).astype(f32)
    y = jax.lax.conv_general_dilated(
        h1b, w2b, window_strides=(1, 1),
        padding=((dilation, dilation), (dilation, dilation)),
        rhs_dilation=(dilation, dilation),
        dimension_numbers=('NHWC', 'HWIO', 'NHWC'),
        precision=hi)
    return jax.nn.relu(y)


if __name__ == "__main__":
    # ---- Tests 1/2: toy DenseAsppBlock (input_num=8, num1=16, num2=8, d=2) ----
    N, H, W, Cin = 2, 16, 16, 8
    C1, C2 = 16, 8
    dilation = 2
    drop_out = 0.1
    eps = 1e-5

    key = jax.random.PRNGKey(0)
    (k_x, k_w1, k_w2, k_g, k_b, k_m, k_v,
     k_x2, k_w1b, k_w2b) = jax.random.split(key, 10)

    x = jax.random.normal(k_x, (N, H, W, Cin), jnp.float32)   # NHWC

    # c2_xavier_fill == kaiming_uniform_(a=1): U(-sqrt(3/fan_in), sqrt(3/fan_in))
    b1 = float(np.sqrt(3.0 / Cin))
    w1 = jax.random.uniform(k_w1, (Cin, C1), jnp.float32, -b1, b1)
    b2 = float(np.sqrt(3.0 / (C1 * 9)))
    w2 = jax.random.uniform(k_w2, (3, 3, C1, C2), jnp.float32, -b2, b2)  # HWIO

    # BatchNorm folded into a per-channel affine (inference form).
    gamma = 1.0 + 0.1 * jax.random.normal(k_g, (C1,), jnp.float32)
    beta = 0.1 * jax.random.normal(k_b, (C1,), jnp.float32)
    r_mean = 0.05 * jax.random.normal(k_m, (C1,), jnp.float32)
    r_var = 1.0 + 0.1 * jnp.abs(jax.random.normal(k_v, (C1,), jnp.float32))
    bn_scale = gamma / jnp.sqrt(r_var + eps)
    bn_shift = beta - r_mean * bn_scale

    ref = np.asarray(reference_no_dropout(x, w1, bn_scale, bn_shift, w2,
                                          dilation=dilation))
    x_bf16 = x.astype(jnp.bfloat16)   # bf16 input: halves the dominant HBM read

    # 1) p = 0: exact-path check (no dropout randomness involved).
    out0 = dense_aspp_block(x_bf16, w1, bn_scale, bn_shift, w2,
                            dilation=dilation, drop_out=0.0, row_tile=8)
    out0 = np.asarray(jax.block_until_ready(out0))
    assert out0.shape == (N, H, W, C2)
    assert np.allclose(out0, ref, rtol=2e-2, atol=2e-2), "no-dropout mismatch"

    # 2) p = 0.1: surviving elements equal ref / (1 - p); rough drop rate.
    out = dense_aspp_block(x_bf16, w1, bn_scale, bn_shift, w2,
                           dilation=dilation, drop_out=drop_out, seed=1234,
                           row_tile=8)
    out_np = np.asarray(jax.block_until_ready(out))
    assert out_np.shape == (N, H, W, C2)
    mask = out_np != 0.0
    assert mask.sum() > 0
    assert np.allclose(out_np[mask] * (1.0 - drop_out), ref[mask],
                       rtol=2e-2, atol=2e-2), "dropout-kept values mismatch"
    pos = ref > 1e-3
    drop_frac = float((out_np[pos] == 0.0).mean())
    assert 0.02 < drop_frac < 0.30, f"drop rate {drop_frac} far from p={drop_out}"

    # 3) Larger-Cin config exercising the Cin-reduction grid axis (KC = 2).
    N2, H2, W2, Cin2, C1b, C2b, d2 = 1, 16, 16, 256, 32, 16, 3
    x2 = jax.random.normal(k_x2, (N2, H2, W2, Cin2), jnp.float32)
    b1b = float(np.sqrt(3.0 / Cin2))
    w1b = jax.random.uniform(k_w1b, (Cin2, C1b), jnp.float32, -b1b, b1b)
    b2b = float(np.sqrt(3.0 / (C1b * 9)))
    w2b = jax.random.uniform(k_w2b, (3, 3, C1b, C2b), jnp.float32, -b2b, b2b)
    scale2 = jnp.ones((C1b,), jnp.float32)
    shift2 = jnp.zeros((C1b,), jnp.float32)
    ref2 = np.asarray(reference_no_dropout(x2, w1b, scale2, shift2, w2b,
                                           dilation=d2))
    out2 = dense_aspp_block(x2.astype(jnp.bfloat16), w1b, scale2, shift2, w2b,
                            dilation=d2, drop_out=0.0, row_tile=8,
                            cin_tile=128)
    out2 = np.asarray(jax.block_until_ready(out2))
    assert out2.shape == (N2, H2, W2, C2b)
    assert np.allclose(out2, ref2, rtol=2e-2, atol=2e-2), "Cin-chunked mismatch"

    print("KERNEL_OK")
</pallas_src>

<mosaic_0001>
module attributes {stable_mosaic.version = 11 : i64} {
  func.func @_dense_aspp_kernel(%arg0: i32, %arg1: i32, %arg2: i32, %arg3: memref<1xi32, #tpu.memory_space<smem>>, %arg4: memref<1x8x16x8xbf16, #tpu.memory_space<vmem>>, %arg5: memref<8x128xbf16, #tpu.memory_space<vmem>>, %arg6: memref<1x128xf32, #tpu.memory_space<vmem>>, %arg7: memref<9x128x128xbf16, #tpu.memory_space<vmem>>, %arg8: memref<1x8x16x8xf32, #tpu.memory_space<vmem>>, %arg9: memref<20x48x128xbf16, #tpu.memory_space<vmem>>, %arg10: memref<128x128xf32, #tpu.memory_space<vmem>>) attributes {dimension_semantics = [#tpu.dimension_semantics<parallel>, #tpu.dimension_semantics<arbitrary>, #tpu.dimension_semantics<arbitrary>], iteration_bounds = array<i64: 2, 3, 1>, scalar_prefetch = 1 : i64, scratch_operands = 2 : i64, tpu.core_type = #tpu.core_type<tc>, window_params = [{transform_indices = @transform_0, window_bounds = array<i64: 1, 8, 16, 8>}, {transform_indices = @transform_1, window_bounds = array<i64: 8, 128>}, {pipeline_mode = #tpu.pipeline_mode<synchronous>, transform_indices = @transform_2, window_bounds = array<i64: 1, 128>}, {pipeline_mode = #tpu.pipeline_mode<synchronous>, transform_indices = @transform_3, window_bounds = array<i64: 9, 128, 128>}, {transform_indices = @transform_4, window_bounds = array<i64: 1, 8, 16, 8>}]} {
    %c0_i32 = arith.constant 0 : i32
    %0 = arith.cmpi eq, %arg1, %c0_i32 : i32
    %c0_i32_0 = arith.constant 0 : i32
    %1 = arith.cmpi eq, %arg2, %c0_i32_0 : i32
    %2 = arith.andi %0, %1 : i1
    %3 = arith.extui %2 : i1 to i32
    %c0_i32_1 = arith.constant 0 : i32
    %4 = arith.cmpi ne, %3, %c0_i32_1 : i32
    scf.if %4 {
      %cst = arith.constant 0.000000e+00 : bf16
      %18 = vector.broadcast %cst : bf16 to vector<2x48x128xbf16>
      %c0 = arith.constant 0 : index
      %c0_8 = arith.constant 0 : index
      %c0_9 = arith.constant 0 : index
      %19 = vector.load %arg9[%c0, %c0_8, %c0_9] : memref<20x48x128xbf16, #tpu.memory_space<vmem>>, vector<2x48x128xbf16>
      tpu.vector_store %arg9[%c0, %c0_8, %c0_9], %18 {strides = array<i32>} : memref<20x48x128xbf16, #tpu.memory_space<vmem>>, vector<2x48x128xbf16>,
      %cst_10 = arith.constant 0.000000e+00 : bf16
      %20 = vector.broadcast %cst_10 : bf16 to vector<2x48x128xbf16>
      %c18 = arith.constant 18 : index
      %c0_11 = arith.constant 0 : index
      %c0_12 = arith.constant 0 : index
      %21 = vector.load %arg9[%c18, %c0_11, %c0_12] : memref<20x48x128xbf16, #tpu.memory_space<vmem>>, vector<2x48x128xbf16>
      tpu.vector_store %arg9[%c18, %c0_11, %c0_12], %20 {strides = array<i32>} : memref<20x48x128xbf16, #tpu.memory_space<vmem>>, vector<2x48x128xbf16>,
      %cst_13 = arith.constant 0.000000e+00 : bf16
      %22 = vector.broadcast %cst_13 : bf16 to vector<16x16x128xbf16>
      %c2 = arith.constant 2 : index
      %c0_14 = arith.constant 0 : index
      %c0_15 = arith.constant 0 : index
      %23 = vector.load %arg9[%c2, %c0_14, %c0_15] : memref<20x48x128xbf16, #tpu.memory_space<vmem>>, vector<16x16x128xbf16>
      tpu.vector_store %arg9[%c2, %c0_14, %c0_15], %22 {strides = array<i32>} : memref<20x48x128xbf16, #tpu.memory_space<vmem>>, vector<16x16x128xbf16>,
      %cst_16 = arith.constant 0.000000e+00 : bf16
      %24 = vector.broadcast %cst_16 : bf16 to vector<16x16x128xbf16>
      %c2_17 = arith.constant 2 : index
      %c32 = arith.constant 32 : index
      %c0_18 = arith.constant 0 : index
      %25 = vector.load %arg9[%c2_17, %c32, %c0_18] : memref<20x48x128xbf16, #tpu.memory_space<vmem>>, vector<16x16x128xbf16>
      tpu.vector_store %arg9[%c2_17, %c32, %c0_18], %24 {strides = array<i32>} : memref<20x48x128xbf16, #tpu.memory_space<vmem>>, vector<16x16x128xbf16>,
    } else {
    }
    %c2_i32 = arith.constant 2 : i32
    %5 = arith.cmpi slt, %arg1, %c2_i32 : i32
    %6 = arith.extui %5 : i1 to i32
    %c0_i32_2 = arith.constant 0 : i32
    %7 = arith.cmpi ne, %6, %c0_i32_2 : i32
    scf.if %7 {
      %c0 = arith.constant 0 : index
      %c0_8 = arith.constant 0 : index
      %c0_9 = arith.constant 0 : index
      %c0_10 = arith.constant 0 : index
      %18 = vector.load %arg4[%c0, %c0_8, %c0_9, %c0_10] : memref<1x8x16x8xbf16, #tpu.memory_space<vmem>>, vector<1x8x16x8xbf16>
      %19 = vector.shape_cast %18 : vector<1x8x16x8xbf16> to vector<8x16x8xbf16>
      %20 = vector.shape_cast %19 : vector<8x16x8xbf16> to vector<128x8xbf16>
      %c0_11 = arith.constant 0 : index
      %c0_12 = arith.constant 0 : index
      %21 = vector.load %arg5[%c0_11, %c0_12] : memref<8x128xbf16, #tpu.memory_space<vmem>>, vector<8x128xbf16>
      %cst = arith.constant dense<0.000000e+00> : vector<128x128xf32>
      %22 = tpu.matmul %20, %21, %cst {dimension_numbers = #tpu.dot_dimension_numbers<[1], [0], [0], [1], [0, 0, 1, 1], [], []>} : vector<128x8xbf16>, vector<8x128xbf16>, vector<128x128xf32> -> vector<128x128xf32>
      %c0_13 = arith.constant 0 : index
      %c0_14 = arith.constant 0 : index
      %23 = vector.load %arg10[%c0_13, %c0_14] : memref<128x128xf32, #tpu.memory_space<vmem>>, vector<128x128xf32>
      tpu.vector_store %arg10[%c0_13, %c0_14], %22 {strides = array<i32>} : memref<128x128xf32, #tpu.memory_space<vmem>>, vector<128x128xf32>,
    } else {
    }
    %c2_i32_3 = arith.constant 2 : i32
    %8 = arith.cmpi slt, %arg1, %c2_i32_3 : i32
    %c0_i32_4 = arith.constant 0 : i32
    %9 = arith.cmpi eq, %arg2, %c0_i32_4 : i32
    %10 = arith.andi %8, %9 : i1
    %11 = arith.extui %10 : i1 to i32
    %c0_i32_5 = arith.constant 0 : i32
    %12 = arith.cmpi ne, %11, %c0_i32_5 : i32
    scf.if %12 {
      %c0 = arith.constant 0 : index
      %c0_8 = arith.constant 0 : index
      %18 = vector.load %arg10[%c0, %c0_8] : memref<128x128xf32, #tpu.memory_space<vmem>>, vector<128x128xf32>
      %c0_9 = arith.constant 0 : index
      %c0_10 = arith.constant 0 : index
      %19 = vector.load %arg6[%c0_9, %c0_10] : memref<1x128xf32, #tpu.memory_space<vmem>>, vector<1x128xf32>
      %20 = vector.broadcast %19 : vector<1x128xf32> to vector<128x128xf32>
      %21 = arith.addf %18, %20 : vector<128x128xf32>
      %cst = arith.constant 0.000000e+00 : f32
      %22 = vector.broadcast %cst : f32 to vector<128x128xf32>
      %23 = arith.maximumf %21, %22 : vector<128x128xf32>
      %24 = arith.truncf %23 : vector<128x128xf32> to vector<128x128xbf16>
      %25 = vector.shape_cast %24 : vector<128x128xbf16> to vector<8x16x128xbf16>
      %c8_i32 = arith.constant 8 : i32
      %26 = arith.muli %arg1, %c8_i32 : i32
      %c2_i32_11 = arith.constant 2 : i32
      %27 = arith.addi %c2_i32_11, %26 : i32
      %28 = arith.index_cast %27 : i32 to index
      %c16 = arith.constant 16 : index
      %c0_12 = arith.constant 0 : index
      %29 = vector.load %arg9[%28, %c16, %c0_12] : memref<20x48x128xbf16, #tpu.memory_space<vmem>>, vector<8x16x128xbf16>
      tpu.vector_store %arg9[%28, %c16, %c0_12], %25 {strides = array<i32>} : memref<20x48x128xbf16, #tpu.memory_space<vmem>>, vector<8x16x128xbf16>,
    } else {
    }
    %c1_i32 = arith.constant 1 : i32
    %13 = arith.cmpi sge, %arg1, %c1_i32 : i32
    %c0_i32_6 = arith.constant 0 : i32
    %14 = arith.cmpi eq, %arg2, %c0_i32_6 : i32
    %15 = arith.andi %13, %14 : i1
    %16 = arith.extui %15 : i1 to i32
    %c0_i32_7 = arith.constant 0 : i32
    %17 = arith.cmpi ne, %16, %c0_i32_7 : i32
    scf.if %17 {
      %c1_i32_8 = arith.constant 1 : i32
      %18 = arith.subi %arg1, %c1_i32_8 : i32
      %c8_i32 = arith.constant 8 : i32
      %19 = arith.muli %18, %c8_i32 : i32
      %cst = arith.constant 0.000000e+00 : f32
      %20 = vector.broadcast %cst : f32 to vector<128x128xf32>
      %c0_i32_9 = arith.constant 0 : i32
      %21 = arith.addi %19, %c0_i32_9 : i32
      %22 = arith.index_cast %21 : i32 to index
      %c14 = arith.constant 14 : index
      %c0 = arith.constant 0 : index
      %23 = vector.load %arg9[%22, %c14, %c0] : memref<20x48x128xbf16, #tpu.memory_space<vmem>>, vector<8x16x128xbf16>
      %24 = vector.shape_cast %23 : vector<8x16x128xbf16> to vector<128x128xbf16>
      %c0_10 = arith.constant 0 : index
      %c0_11 = arith.constant 0 : index
      %c0_12 = arith.constant 0 : index
      %25 = vector.load %arg7[%c0_10, %c0_11, %c0_12] : memref<9x128x128xbf16, #tpu.memory_space<vmem>>, vector<1x128x128xbf16>
      %26 = vector.shape_cast %25 : vector<1x128x128xbf16> to vector<128x128xbf16>
      %cst_13 = arith.constant dense<0.000000e+00> : vector<128x128xf32>
      %27 = tpu.matmul %24, %26, %cst_13 {dimension_numbers = #tpu.dot_dimension_numbers<[1], [0], [0], [1], [0, 0, 1, 1], [], []>} : vector<128x128xbf16>, vector<128x128xbf16>, vector<128x128xf32> -> vector<128x128xf32>
      %28 = arith.addf %20, %27 : vector<128x128xf32>
      %c0_i32_14 = arith.constant 0 : i32
      %29 = arith.addi %19, %c0_i32_14 : i32
      %30 = arith.index_cast %29 : i32 to index
      %c16 = arith.constant 16 : index
      %c0_15 = arith.constant 0 : index
      %31 = vector.load %arg9[%30, %c16, %c0_15] : memref<20x48x128xbf16, #tpu.memory_space<vmem>>, vector<8x16x128xbf16>
      %32 = vector.shape_cast %31 : vector<8x16x128xbf16> to vector<128x128xbf16>
      %c1 = arith.constant 1 : index
      %c0_16 = arith.constant 0 : index
      %c0_17 = arith.constant 0 : index
      %33 = vector.load %arg7[%c1, %c0_16, %c0_17] : memref<9x128x128xbf16, #tpu.memory_space<vmem>>, vector<1x128x128xbf16>
      %34 = vector.shape_cast %33 : vector<1x128x128xbf16> to vector<128x128xbf16>
      %cst_18 = arith.constant dense<0.000000e+00> : vector<128x128xf32>
      %35 = tpu.matmul %32, %34, %cst_18 {dimension_numbers = #tpu.dot_dimension_numbers<[1], [0], [0], [1], [0, 0, 1, 1], [], []>} : vector<128x128xbf16>, vector<128x128xbf16>, vector<128x128xf32> -> vector<128x128xf32>
      %36 = arith.addf %28, %35 : vector<128x128xf32>
      %c0_i32_19 = arith.constant 0 : i32
      %37 = arith.addi %19, %c0_i32_19 : i32
      %38 = arith.index_cast %37 : i32 to index
      %c18 = arith.constant 18 : index
      %c0_20 = arith.constant 0 : index
      %39 = vector.load %arg9[%38, %c18, %c0_20] : memref<20x48x128xbf16, #tpu.memory_space<vmem>>, vector<8x16x128xbf16>
      %40 = vector.shape_cast %39 : vector<8x16x128xbf16> to vector<128x128xbf16>
      %c2 = arith.constant 2 : index
      %c0_21 = arith.constant 0 : index
      %c0_22 = arith.constant 0 : index
      %41 = vector.load %arg7[%c2, %c0_21, %c0_22] : memref<9x128x128xbf16, #tpu.memory_space<vmem>>, vector<1x128x128xbf16>
      %42 = vector.shape_cast %41 : vector<1x128x128xbf16> to vector<128x128xbf16>
      %cst_23 = arith.constant dense<0.000000e+00> : vector<128x128xf32>
      %43 = tpu.matmul %40, %42, %cst_23 {dimension_numbers = #tpu.dot_dimension_numbers<[1], [0], [0], [1], [0, 0, 1, 1], [], []>} : vector<128x128xbf16>, vector<128x128xbf16>, vector<128x128xf32> -> vector<128x128xf32>
      %44 = arith.addf %36, %43 : vector<128x128xf32>
      %c2_i32_24 = arith.constant 2 : i32
      %45 = arith.addi %19, %c2_i32_24 : i32
      %46 = arith.index_cast %45 : i32 to index
      %c14_25 = arith.constant 14 : index
      %c0_26 = arith.constant 0 : index
      %47 = vector.load %arg9[%46, %c14_25, %c0_26] : memref<20x48x128xbf16, #tpu.memory_space<vmem>>, vector<8x16x128xbf16>
      %48 = vector.shape_cast %47 : vector<8x16x128xbf16> to vector<128x128xbf16>
      %c3 = arith.constant 3 : index
      %c0_27 = arith.constant 0 : index
      %c0_28 = arith.constant 0 : index
      %49 = vector.load %arg7[%c3, %c0_27, %c0_28] : memref<9x128x128xbf16, #tpu.memory_space<vmem>>, vector<1x128x128xbf16>
      %50 = vector.shape_cast %49 : vector<1x128x128xbf16> to vector<128x128xbf16>
      %cst_29 = arith.constant dense<0.000000e+00> : vector<128x128xf32>
      %51 = tpu.matmul %48, %50, %cst_29 {dimension_numbers = #tpu.dot_dimension_numbers<[1], [0], [0], [1], [0, 0, 1, 1], [], []>} : vector<128x128xbf16>, vector<128x128xbf16>, vector<128x128xf32> -> vector<128x128xf32>
      %52 = arith.addf %44, %51 : vector<128x128xf32>
      %c2_i32_30 = arith.constant 2 : i32
      %53 = arith.addi %19, %c2_i32_30 : i32
      %54 = arith.index_cast %53 : i32 to index
      %c16_31 = arith.constant 16 : index
      %c0_32 = arith.constant 0 : index
      %55 = vector.load %arg9[%54, %c16_31, %c0_32] : memref<20x48x128xbf16, #tpu.memory_space<vmem>>, vector<8x16x128xbf16>
      %56 = vector.shape_cast %55 : vector<8x16x128xbf16> to vector<128x128xbf16>
      %c4 = arith.constant 4 : index
      %c0_33 = arith.constant 0 : index
      %c0_34 = arith.constant 0 : index
      %57 = vector.load %arg7[%c4, %c0_33, %c0_34] : memref<9x128x128xbf16, #tpu.memory_space<vmem>>, vector<1x128x128xbf16>
      %58 = vector.shape_cast %57 : vector<1x128x128xbf16> to vector<128x128xbf16>
      %cst_35 = arith.constant dense<0.000000e+00> : vector<128x128xf32>
      %59 = tpu.matmul %56, %58, %cst_35 {dimension_numbers = #tpu.dot_dimension_numbers<[1], [0], [0], [1], [0, 0, 1, 1], [], []>} : vector<128x128xbf16>, vector<128x128xbf16>, vector<128x128xf32> -> vector<128x128xf32>
      %60 = arith.addf %52, %59 : vector<128x128xf32>
      %c2_i32_36 = arith.constant 2 : i32
      %61 = arith.addi %19, %c2_i32_36 : i32
      %62 = arith.index_cast %61 : i32 to index
      %c18_37 = arith.constant 18 : index
      %c0_38 = arith.constant 0 : index
      %63 = vector.load %arg9[%62, %c18_37, %c0_38] : memref<20x48x128xbf16, #tpu.memory_space<vmem>>, vector<8x16x128xbf16>
      %64 = vector.shape_cast %63 : vector<8x16x128xbf16> to vector<128x128xbf16>
      %c5 = arith.constant 5 : index
      %c0_39 = arith.constant 0 : index
      %c0_40 = arith.constant 0 : index
      %65 = vector.load %arg7[%c5, %c0_39, %c0_40] : memref<9x128x128xbf16, #tpu.memory_space<vmem>>, vector<1x128x128xbf16>
      %66 = vector.shape_cast %65 : vector<1x128x128xbf16> to vector<128x128xbf16>
      %cst_41 = arith.constant dense<0.000000e+00> : vector<128x128xf32>
      %67 = tpu.matmul %64, %66, %cst_41 {dimension_numbers = #tpu.dot_dimension_numbers<[1], [0], [0], [1], [0, 0, 1, 1], [], []>} : vector<128x128xbf16>, vector<128x128xbf16>, vector<128x128xf32> -> vector<128x128xf32>
      %68 = arith.addf %60, %67 : vector<128x128xf32>
      %c4_i32 = arith.constant 4 : i32
      %69 = arith.addi %19, %c4_i32 : i32
      %70 = arith.index_cast %69 : i32 to index
      %c14_42 = arith.constant 14 : index
      %c0_43 = arith.constant 0 : index
      %71 = vector.load %arg9[%70, %c14_42, %c0_43] : memref<20x48x128xbf16, #tpu.memory_space<vmem>>, vector<8x16x128xbf16>
      %72 = vector.shape_cast %71 : vector<8x16x128xbf16> to vector<128x128xbf16>
      %c6 = arith.constant 6 : index
      %c0_44 = arith.constant 0 : index
      %c0_45 = arith.constant 0 : index
      %73 = vector.load %arg7[%c6, %c0_44, %c0_45] : memref<9x128x128xbf16, #tpu.memory_space<vmem>>, vector<1x128x128xbf16>
      %74 = vector.shape_cast %73 : vector<1x128x128xbf16> to vector<128x128xbf16>
      %cst_46 = arith.constant dense<0.000000e+00> : vector<128x128xf32>
      %75 = tpu.matmul %72, %74, %cst_46 {dimension_numbers = #tpu.dot_dimension_numbers<[1], [0], [0], [1], [0, 0, 1, 1], [], []>} : vector<128x128xbf16>, vector<128x128xbf16>, vector<128x128xf32> -> vector<128x128xf32>
      %76 = arith.addf %68, %75 : vector<128x128xf32>
      %c4_i32_47 = arith.constant 4 : i32
      %77 = arith.addi %19, %c4_i32_47 : i32
      %78 = arith.index_cast %77 : i32 to index
      %c16_48 = arith.constant 16 : index
      %c0_49 = arith.constant 0 : index
      %79 = vector.load %arg9[%78, %c16_48, %c0_49] : memref<20x48x128xbf16, #tpu.memory_space<vmem>>, vector<8x16x128xbf16>
      %80 = vector.shape_cast %79 : vector<8x16x128xbf16> to vector<128x128xbf16>
      %c7 = arith.constant 7 : index
      %c0_50 = arith.constant 0 : index
      %c0_51 = arith.constant 0 : index
      %81 = vector.load %arg7[%c7, %c0_50, %c0_51] : memref<9x128x128xbf16, #tpu.memory_space<vmem>>, vector<1x128x128xbf16>
      %82 = vector.shape_cast %81 : vector<1x128x128xbf16> to vector<128x128xbf16>
      %cst_52 = arith.constant dense<0.000000e+00> : vector<128x128xf32>
      %83 = tpu.matmul %80, %82, %cst_52 {dimension_numbers = #tpu.dot_dimension_numbers<[1], [0], [0], [1], [0, 0, 1, 1], [], []>} : vector<128x128xbf16>, vector<128x128xbf16>, vector<128x128xf32> -> vector<128x128xf32>
      %84 = arith.addf %76, %83 : vector<128x128xf32>
      %c4_i32_53 = arith.constant 4 : i32
      %85 = arith.addi %19, %c4_i32_53 : i32
      %86 = arith.index_cast %85 : i32 to index
      %c18_54 = arith.constant 18 : index
      %c0_55 = arith.constant 0 : index
      %87 = vector.load %arg9[%86, %c18_54, %c0_55] : memref<20x48x128xbf16, #tpu.memory_space<vmem>>, vector<8x16x128xbf16>
      %88 = vector.shape_cast %87 : vector<8x16x128xbf16> to vector<128x128xbf16>
      %c8 = arith.constant 8 : index
      %c0_56 = arith.constant 0 : index
      %c0_57 = arith.constant 0 : index
      %89 = vector.load %arg7[%c8, %c0_56, %c0_57] : memref<9x128x128xbf16, #tpu.memory_space<vmem>>, vector<1x128x128xbf16>
      %90 = vector.shape_cast %89 : vector<1x128x128xbf16> to vector<128x128xbf16>
      %cst_58 = arith.constant dense<0.000000e+00> : vector<128x128xf32>
      %91 = tpu.matmul %88, %90, %cst_58 {dimension_numbers = #tpu.dot_dimension_numbers<[1], [0], [0], [1], [0, 0, 1, 1], [], []>} : vector<128x128xbf16>, vector<128x128xbf16>, vector<128x128xf32> -> vector<128x128xf32>
      %92 = arith.addf %84, %91 : vector<128x128xf32>
      %cst_59 = arith.constant 0.000000e+00 : f32
      %93 = vector.broadcast %cst_59 : f32 to vector<128x128xf32>
      %94 = arith.maximumf %92, %93 : vector<128x128xf32>
      %95 = vector.extract_strided_slice %94 {offsets = [0, 0], sizes = [128, 8], strides = [1, 1]} : vector<128x128xf32> to vector<128x8xf32>
      %96 = vector.shape_cast %95 : vector<128x8xf32> to vector<8x16x8xf32>
      %c0_60 = arith.constant 0 : index
      %c0_61 = arith.constant 0 : index
      %c0_62 = arith.constant 0 : index
      %c0_63 = arith.constant 0 : index
      %97 = vector.load %arg8[%c0_60, %c0_61, %c0_62, %c0_63] : memref<1x8x16x8xf32, #tpu.memory_space<vmem>>, vector<1x8x16x8xf32>
      %98 = vector.shape_cast %97 : vector<1x8x16x8xf32> to vector<8x16x8xf32>
      %99 = vector.shape_cast %96 : vector<8x16x8xf32> to vector<1x8x16x8xf32>
      tpu.vector_store %arg8[%c0_60, %c0_61, %c0_62, %c0_63], %99 {strides = array<i32>} : memref<1x8x16x8xf32, #tpu.memory_space<vmem>>, vector<1x8x16x8xf32>,
    } else {
    }
    return
  }
  func.func @transform_0(%arg0: i32, %arg1: i32, %arg2: i32, %arg3: memref<1xi32, #tpu.memory_space<smem>>) -> (i32, i32, i32, i32) {
    %c1_i32 = arith.constant 1 : i32
    %0 = arith.minsi %arg1, %c1_i32 : i32
    %c2_i32 = arith.constant 2 : i32
    %1 = arith.cmpi sge, %arg1, %c2_i32 : i32
    %c0_i32 = arith.constant 0 : i32
    %2 = arith.select %1, %c0_i32, %arg2 : i32
    %c0_i32_0 = arith.constant 0 : i32
    %c0_i32_1 = arith.constant 0 : i32
    return %arg0, %0, %c0_i32_0, %2 : i32, i32, i32, i32
  }
  func.func @transform_1(%arg0: i32, %arg1: i32, %arg2: i32, %arg3: memref<1xi32, #tpu.memory_space<smem>>) -> (i32, i32) {
    %c2_i32 = arith.constant 2 : i32
    %0 = arith.cmpi sge, %arg1, %c2_i32 : i32
    %c0_i32 = arith.constant 0 : i32
    %1 = arith.select %0, %c0_i32, %arg2 : i32
    %c0_i32_0 = arith.constant 0 : i32
    %c0_i32_1 = arith.constant 0 : i32
    return %1, %c0_i32_0 : i32, i32
  }
  func.func @transform_2(%arg0: i32, %arg1: i32, %arg2: i32, %arg3: memref<1xi32, #tpu.memory_space<smem>>) -> (i32, i32) {
    %c0_i32 = arith.constant 0 : i32
    %c0_i32_0 = arith.constant 0 : i32
    %c0_i32_1 = arith.constant 0 : i32
    return %c0_i32, %c0_i32_0 : i32, i32
  }
  func.func @transform_3(%arg0: i32, %arg1: i32, %arg2: i32, %arg3: memref<1xi32, #tpu.memory_space<smem>>) -> (i32, i32, i32) {
    %c0_i32 = arith.constant 0 : i32
    %c0_i32_0 = arith.constant 0 : i32
    %c0_i32_1 = arith.constant 0 : i32
    %c0_i32_2 = arith.constant 0 : i32
    return %c0_i32, %c0_i32_0, %c0_i32_1 : i32, i32, i32
  }
  func.func @transform_4(%arg0: i32, %arg1: i32, %arg2: i32, %arg3: memref<1xi32, #tpu.memory_space<smem>>) -> (i32, i32, i32, i32) {
    %c1_i32 = arith.constant 1 : i32
    %0 = arith.subi %arg1, %c1_i32 : i32
    %c0_i32 = arith.constant 0 : i32
    %1 = arith.maxsi %0, %c0_i32 : i32
    %c0_i32_0 = arith.constant 0 : i32
    %c0_i32_1 = arith.constant 0 : i32
    %c0_i32_2 = arith.constant 0 : i32
    return %arg0, %1, %c0_i32_0, %c0_i32_1 : i32, i32, i32, i32
  }
}

</mosaic_0001>

<bundles_post_ra>
// kernel: tpu_custom_call.1
= control target key start
LH: loop header
LB: loop body
LE: loop exit
PB: predicated region body
PF: predicated region fallthrough
CT: control target
= control target key end

     0   :  { %11 = vsyncpa [#allocation7], 0  ;;  %s3932_s18 = smov 0   ;;  %s3934_s19 = smov 0   ;;  %s4303_s0 = inlined_call_operand.<no memory space> [shape: s32[1], index: 0, kind: input, shape index: {}]   ;;  %s4304_s1 = inlined_call_operand.vmem [shape: bf16[2,16,16,8], index: 1, kind: input, shape index: {}]   ;;  %s4305_s2 = inlined_call_operand.vmem [shape: bf16[8,128], index: 2, kind: input, shape index: {}]   ;;  %s4306_s3 = inlined_call_operand.vmem [shape: f32[1,128], index: 3, kind: input, shape index: {}]   ;;  %s4307_s4 = inlined_call_operand.hbm [shape: bf16[9,128,128], index: 4, kind: input, shape index: {}]   ;;  %s4308_s5 = inlined_call_operand.vmem [shape: f32[2,16,16,8], index: 5, kind: output, shape index: {}]  }
   0x1   :  { %s3936_s0 = smov 0   ;;  %s3938_s20 = smov 0  }
   0x2   :  { %s3940_s21 = smov 0  }
   0x3 LB: > { %s2869_s22 = sadd.s32 4294967295, %s3896_s21   ;;  %s32_s23 = sadd.s32 1, %s3888_s0  ;;  %s3896_s21 = sphi %s3940_s21, %s17_s21   ;;  %s3892_s20 = sphi %s3938_s20, %s4320_s20   ;;  %s3888_s0 = sphi %s3936_s0, %s4319_s0   ;;  %s3884_s19 = sphi %s3934_s19, %s4318_s19   ;;  %s3880_s18 = sphi %s3932_s18, %s4317_s18  }
   0x4   : > { %p34_p0 = scmp.ge.s32.totalorder %s32_s23, 3  ;;  %s36_s24 = sadd.s32 1, %s3892_s20 }
   0x5   : > { %p2873_p1 = scmp.ge.s32.totalorder %s3896_s21, 1  ;;  %p185_p2 = scmp.lt.s32.totalorder %s3896_s21, 7 }
   0x6   : > { %s4322_s23 = smov (%p34_p0, %s32_s23), 0  ;;  %s4324_s24 = smov (!%p34_p0, %s36_s24), %s3892_s20 }
   0x7   : > { %p3965_p3 = pnand %p2873_p1, %p185_p2  ;;  %p38_p4 = scmp.ge.s32.totalorder %s4324_s24, 2 }
   0x8   : > { %p3969_p5 = scmp.eq.s32.totalorder %s2869_s22, 0  ;;  %s3898_s27 = smov [#allocation6]  }
   0x9   : > { %s4312_s25 = scalar_select %p3965_p3, 1, 0 }
   0xa   : > { %s4313_s26 = scalar_select %p3969_p5, 1, 0 }
   0xb   : > { %p3696_p6 = pneg %p3965_p3  ;;  %s4326_s24 = smov (%p38_p4, %s4324_s24), 0 }
   0xc   : > { %s200_s28 = sshll.u32 %s3898_s27, 4  ;;  %s3826_s7 = scalar_lea.hbm %s4307_s4, 9216  ;;  %s201_s28 = int_to_ptr.vmem [resolvable:$true] %s200_s28 }
   0xd   : > { %p3979_p7 = pnand %p3969_p5, %p3696_p6  ;;  %p3827_p8 = scmp.ne.s32.totalorder %s4307_s4, %s3826_s7 }
   0xe   : > { %p3833_p12 = scmp.lt.u32.totalorder %s3826_s7, %s4307_s4 }
   0xf   : > { %p3828_p9 = pneg %p3979_p7 }
  0x11   : > { %p3829_p10 = pnand %p3828_p9, %p3827_p8 }
  0x13   : > { %p3830_p11 = pneg %p3829_p10 }
  0x15   : > { %p3835_p13 = pnand %p3833_p12, %p3830_p11 }
  0x17   : > { %3838 = shalt.err (!%p3835_p13)
}
  0x18   : > { %s3839_s12 = scalar_lea.vmem %s201_s28, 9216  ;;  %p3847_p4 = scmp.lt.s32.totalorder %s201_s28, %s201_s28 }
  0x19   : > { %p3840_p0 = scmp.ne.s32.totalorder %s201_s28, %s3839_s12  ;;  %p3848_p6 = scmp.lt.s32.totalorder %s3839_s12, %s3839_s12 }
  0x1b   : > { %p3842_p1 = pnand %p3840_p0, %p3828_p9  ;;  %p3849_p5 = por %p3848_p6, %p3847_p4 }
  0x1d   : > { %p3843_p2 = pneg %p3842_p1 }
  0x1f   : > { %p3850_p3 = pnand %p3849_p5, %p3843_p2 }
  0x21   : > { %3853 = shalt.err (!%p3850_p3)
}
  0x22   : > { %s3899_s13 = smov 64   ;;  %s3900_s14 = smov 4  }
  0x23   : > { %3699 = dma.hbm_to_vmem [thread:$0]  (!%p3979_p7), %s4307_s4, 9216, %s201_s28, [#allocation7], %s3899_s13, %s3899_s13, %s3900_s14  }
  0x24   : > { %p4315_p8 = scmp.ne.s32.totalorder %s4312_s25, 0 }
  0x25   : > { %p4316_p10 = scmp.ne.s32.totalorder (!%p4315_p8), %s4313_s26, 0 }
  0x26   : > { %252 = sbr.rel (%p4315_p8) target bundleno = 710 (0x2c6), region = 36 }
  0x2d   : > { %3875 = dma.done.wait (%p4316_p10), [#allocation7], 9216  }
  0x2e   : > { %3877 = vsyncadd (%p4316_p10), [#allocation7], 4294958080  ;;  %p304_p3 = scmp.lt.s32.totalorder %s3880_s18, 1  ;;  %p309_p5 = scmp.lt.s32.totalorder %s3884_s19, 1 }
  0x2f   : > { %s4008_s17 = sadd.s32 4294967295, %s3880_s18  ;;  %p352_p7 = scmp.eq.s32.totalorder %s3880_s18, 0 }
  0x30   : > { %s305_s22 = scalar_select %p304_p3, %s3880_s18, 1 }
  0x31   : > { %s4328_s19 = smov (!%p309_p5, %s3884_s19), 1  ;;  %p335_p9 = scmp.gt.s32.totalorder %s4008_s17, 0  ;;  %v3901_v0 = vmov (%p352_p7), 0  }
  0x32   : > { %s2879_s25 = sshll.u32 %s305_s22, 3  ;;  %s2881_s26 = sshll.u32 %s4328_s19, 5  ;;  %358 = vst [vmem:[#allocation2] sm:$0xff] (%p352_p7), %v3901_v0  ;;  %359 = vst [vmem:[#allocation2 + $0x8] sm:$0xff] (%p352_p7), %v3901_v0 }
  0x33   : > { %p311_p11 = scmp.lt.s32.totalorder %s2879_s25, 15  ;;  %360 = vst [vmem:[#allocation2 + $0x10] sm:$0xff] (%p352_p7), %v3901_v0  ;;  %361 = vst [vmem:[#allocation2 + $0x18] sm:$0xff] (%p352_p7), %v3901_v0 }
  0x34   : > { %s336_s27 = scalar_select %p335_p9, %s4008_s17, 0 }
  0x35   : > { %s4330_s25 = smov (!%p311_p11, %s2879_s25), 15  ;;  %362 = vst [vmem:[#allocation2 + $0x20] sm:$0xff] (%p352_p7), %v3901_v0  ;;  %363 = vst [vmem:[#allocation2 + $0x28] sm:$0xff] (%p352_p7), %v3901_v0 }
  0x36   : > { %s2884_s28 = sshll.u32 %s336_s27, 3  ;;  %s2880_s29 = sshll.u32 %s4330_s25, 1  ;;  %365 = vst [vmem:[#allocation2 + $0x1b0] sm:$0xff] (%p352_p7), %v3901_v0  ;;  %366 = vst [vmem:[#allocation2 + $0x1b8] sm:$0xff] (%p352_p7), %v3901_v0 }
  0x37   : > { %p340_p12 = scmp.lt.s32.totalorder %s2884_s28, 15  ;;  %s318_s30 = sadd.s32 %s2881_s26, %s2880_s29  ;;  %367 = vst [vmem:[#allocation2 + $0x1c0] sm:$0xff] (%p352_p7), %v3901_v0  ;;  %368 = vst [vmem:[#allocation2 + $0x1c8] sm:$0xff] (%p352_p7), %v3901_v0 }
  0x38   : > { %s2882_s6 = sshll.u32 %s318_s30, 2  ;;  %357 = sbr.rel (!%p352_p7) target bundleno = 73 (0x49), region = 44  ;;  %369 = vst [vmem:[#allocation2 + $0x1d0] sm:$0xff] (%p352_p7), %v3901_v0  ;;  %370 = vst [vmem:[#allocation2 + $0x1d8] sm:$0xff] (%p352_p7), %v3901_v0 }
  0x39   : > { %s4018_s9 = scalar_lea.vmem %s4304_s1, %s2882_s6  ;;  %s4332_s28 = smov (!%p340_p12, %s2884_s28), 15  ;;  %372 = vst [vmem:[#allocation2 + $0x30] sm:$0xff] (%p352_p7), %v3901_v0  ;;  %373 = vst [vmem:[#allocation2 + $0x48] sm:$0xff] (%p352_p7), %v3901_v0 }
  0x3a   : > { %s2885_s10 = sshll.u32 %s4332_s28, 1  ;;  %374 = vst [vmem:[#allocation2 + $0x60] sm:$0xff] (%p352_p7), %v3901_v0  ;;  %375 = vst [vmem:[#allocation2 + $0x78] sm:$0xff] (%p352_p7), %v3901_v0 }
  0x3b   : > { %s344_s11 = sadd.s32 %s2885_s10, %s2881_s26  ;;  %376 = vst [vmem:[#allocation2 + $0x90] sm:$0xff] (%p352_p7), %v3901_v0  ;;  %377 = vst [vmem:[#allocation2 + $0xa8] sm:$0xff] (%p352_p7), %v3901_v0 }
  0x3c   : > { %s2887_s12 = sshll.u32 %s344_s11, 3  ;;  %378 = vst [vmem:[#allocation2 + $0xc0] sm:$0xff] (%p352_p7), %v3901_v0  ;;  %379 = vst [vmem:[#allocation2 + $0xd8] sm:$0xff] (%p352_p7), %v3901_v0 }
  0x3d   : > { %s4023_s19 = scalar_lea.vmem %s4308_s5, %s2887_s12  ;;  %380 = vst [vmem:[#allocation2 + $0xf0] sm:$0xff] (%p352_p7), %v3901_v0  ;;  %381 = vst [vmem:[#allocation2 + $0x108] sm:$0xff] (%p352_p7), %v3901_v0 }
  0x3e   : > { %382 = vst [vmem:[#allocation2 + $0x120] sm:$0xff] (%p352_p7), %v3901_v0  ;;  %383 = vst [vmem:[#allocation2 + $0x138] sm:$0xff] (%p352_p7), %v3901_v0 }
  0x3f   : > { %384 = vst [vmem:[#allocation2 + $0x150] sm:$0xff] %v3901_v0  ;;  %385 = vst [vmem:[#allocation2 + $0x168] sm:$0xff] %v3901_v0 }
  0x40   : > { %386 = vst [vmem:[#allocation2 + $0x180] sm:$0xff] %v3901_v0  ;;  %387 = vst [vmem:[#allocation2 + $0x198] sm:$0xff] %v3901_v0 }
  0x41   : > { %388 = vst [vmem:[#allocation2 + $0x40] sm:$0xff] %v3901_v0  ;;  %389 = vst [vmem:[#allocation2 + $0x58] sm:$0xff] %v3901_v0 }
  0x42   : > { %390 = vst [vmem:[#allocation2 + $0x70] sm:$0xff] %v3901_v0  ;;  %391 = vst [vmem:[#allocation2 + $0x88] sm:$0xff] %v3901_v0 }
  0x43   : > { %392 = vst [vmem:[#allocation2 + $0xa0] sm:$0xff] %v3901_v0  ;;  %393 = vst [vmem:[#allocation2 + $0xb8] sm:$0xff] %v3901_v0 }
  0x44   : > { %394 = vst [vmem:[#allocation2 + $0xd0] sm:$0xff] %v3901_v0  ;;  %395 = vst [vmem:[#allocation2 + $0xe8] sm:$0xff] %v3901_v0 }
  0x45   : > { %396 = vst [vmem:[#allocation2 + $0x100] sm:$0xff] %v3901_v0  ;;  %397 = vst [vmem:[#allocation2 + $0x118] sm:$0xff] %v3901_v0 }
  0x46   : > { %398 = vst [vmem:[#allocation2 + $0x130] sm:$0xff] %v3901_v0  ;;  %399 = vst [vmem:[#allocation2 + $0x148] sm:$0xff] %v3901_v0 }
  0x47   : > { %400 = vst [vmem:[#allocation2 + $0x160] sm:$0xff] %v3901_v0  ;;  %401 = vst [vmem:[#allocation2 + $0x178] sm:$0xff] %v3901_v0 }
  0x48   : > { %402 = vst [vmem:[#allocation2 + $0x190] sm:$0xff] %v3901_v0  ;;  %403 = vst [vmem:[#allocation2 + $0x1a8] sm:$0xff] %v3901_v0 }
  0x49 PF: > { %p404_p13 = scmp.lt.s32.totalorder %s3880_s18, 2  ;;  %p2889_p0 = scmp.ge.s32.totalorder %s3880_s18, 2 }
  0x4a   : > { %v424_v1 = vld [vmem:[%s4305_s2] sm:$0xf] (!%p2889_p0)  ;;  %vm490_vm0 = vcmask (!%p2889_p0), 1043456   ;;  %vm465_vm1 = vcmask (!%p2889_p0), 64512   ;;  %v3748_v5 = vld [vmem:[%s4018_s9 + $0x8] sm:$0xff] (!%p2889_p0)   ;;  %v3750_v7 = vld [vmem:[%s4018_s9 + $0x10] sm:$0xff] (!%p2889_p0)  }
  0x4b   : > { %407 = sbr.rel (%p2889_p0) target bundleno = 303 (0x12f), region = 48  ;;  %v3746_v2 = vld [vmem:[%s4018_s9] sm:$0xff] (!%p2889_p0)   ;;  %3690 = vmatprep.subr.msk.bf16.mxu0 (!%p2889_p0), %vm490_vm0, %v424_v1  ;;  %3691 = vmatprep.subr.msk.bf16.mxu1 (!%p2889_p0), %vm490_vm0, %v424_v1  ;;  %v492_v3 = vsel (!%p2889_p0), %vm490_vm0, %v424_v1, 0  ;;  %v3749_v6 = vld [vmem:[%s4018_s9 + $0x28] sm:$0xff] (!%p2889_p0)   ;;  %v3751_v8 = vld [vmem:[%s4018_s9 + $0x30] sm:$0xff] (!%p2889_p0)  }
  0x4c   : > { %3239 = vmatpush3.bf16.msra.mxu0 (!%p2889_p0), %v492_v3  ;;  %3545 = vmatpush3.bf16.msra.mxu1 (!%p2889_p0), %v492_v3  ;;  %v3747_v4 = vld [vmem:[%s4018_s9 + $0x20] sm:$0xff] (!%p2889_p0)   ;;  %v3752_v9 = vld [vmem:[%s4018_s9 + $0x18] sm:$0xff] (!%p2889_p0)  }
  0x4d   : > { %3240 = vmatprep.mubr.msk.bf16.mxu0 (!%p2889_p0), %vm465_vm1, %v3746_v2  ;;  %3248 = vmatprep.mubr.msk.bf16.mxu1 (!%p2889_p0), %vm465_vm1, %v3747_v4  ;;  %v3753_v10 = vld [vmem:[%s4018_s9 + $0x38] sm:$0xff] (!%p2889_p0)  }
  0x4f   : > { %3241 = vmatmul.mubr.msk.bf16.vlgmr.msra.gmra.mrb[0].mxu0 (!%p2889_p0), %vm465_vm1, %v3748_v5  ;;  %3249 = vmatmul.mubr.msk.bf16.vlgmr.msra.gmra.mrb[0].mxu1 (!%p2889_p0), %vm465_vm1, %v3749_v6 }
  0x50   : > { %3244 = vmatprep.mubr.msk.bf16.mxu0 (!%p2889_p0), %vm465_vm1, %v3750_v7  ;;  %3252 = vmatprep.mubr.msk.bf16.mxu1 (!%p2889_p0), %vm465_vm1, %v3751_v8 }
  0x57   : > { %3245 = vmatmul.mubr.msk.bf16.gmra.mrb[4].mxu0 %vm465_vm1, %v3752_v9  ;;  %3253 = vmatmul.mubr.msk.bf16.gmra.mrb[4].mxu1 %vm465_vm1, %v3753_v10 }
 0x122   : > { %v3242_v11 = vpop.f32.mrb[0].mxu0  ;;  %v3250_v12 = vpop.f32.mrb[0].mxu1 }
 0x123   : > { %593 = vst [vmem:[#allocation3 + $0x10] sm:$0xff] %v3242_v11  ;;  %v528_v13 = vpop.f32.mrb[1].mxu0  ;;  %601 = vst [vmem:[#allocation3 + $0x50] sm:$0xff] %v3250_v12  ;;  %v560_v14 = vpop.f32.mrb[1].mxu1 }
 0x124   : > { %591 = vst [vmem:[#allocation3] sm:$0xff] %v528_v13  ;;  %v3243_v15 = vpop.f32.mrb[2].mxu0  ;;  %599 = vst [vmem:[#allocation3 + $0x40] sm:$0xff] %v560_v14  ;;  %v3251_v16 = vpop.f32.mrb[2].mxu1 }
 0x125   : > { %594 = vst [vmem:[#allocation3 + $0x18] sm:$0xff] %v3243_v15  ;;  %v531_v17 = vpop.f32.mrb[3].mxu0  ;;  %602 = vst [vmem:[#allocation3 + $0x58] sm:$0xff] %v3251_v16  ;;  %v563_v18 = vpop.f32.mrb[3].mxu1 }
 0x126   : > { %592 = vst [vmem:[#allocation3 + $0x8] sm:$0xff] %v531_v17  ;;  %600 = vst [vmem:[#allocation3 + $0x48] sm:$0xff] %v563_v18 }
 0x12a   : > { %v3246_v19 = vpop.f32.mrb[4].mxu0  ;;  %v3254_v20 = vpop.f32.mrb[4].mxu1 }
 0x12b   : > { %597 = vst [vmem:[#allocation3 + $0x30] sm:$0xff] %v3246_v19  ;;  %v544_v21 = vpop.f32.mrb[5].mxu0  ;;  %605 = vst [vmem:[#allocation3 + $0x70] sm:$0xff] %v3254_v20  ;;  %v576_v22 = vpop.f32.mrb[5].mxu1 }
 0x12c   : > { %595 = vst [vmem:[#allocation3 + $0x20] sm:$0xff] %v544_v21  ;;  %v3247_v23 = vpop.f32.mrb[6].mxu0  ;;  %603 = vst [vmem:[#allocation3 + $0x60] sm:$0xff] %v576_v22  ;;  %v3255_v24 = vpop.f32.mrb[6].mxu1 }
 0x12d   : > { %598 = vst [vmem:[#allocation3 + $0x38] sm:$0xff] %v3247_v23  ;;  %v547_v25 = vpop.f32.mrb[7].mxu0  ;;  %606 = vst [vmem:[#allocation3 + $0x78] sm:$0xff] %v3255_v24  ;;  %v579_v26 = vpop.f32.mrb[7].mxu1 }
 0x12e   : > { %596 = vst [vmem:[#allocation3 + $0x28] sm:$0xff] %v547_v25  ;;  %604 = vst [vmem:[#allocation3 + $0x68] sm:$0xff] %v579_v26 }
 0x12f PF: > { %610 = sbr.rel (!%p404_p13) target bundleno = 319 (0x13f), region = 52  ;;  %v611_v27 = vld [vmem:[#allocation3] sm:$0xff] (%p404_p13)  ;;  %v612_v28 = vld [vmem:[#allocation3 + $0x8] sm:$0xff] (%p404_p13)  ;;  %v613_v32 = vld [vmem:[#allocation3 + $0x10] sm:$0xff] (%p404_p13) }
 0x130   : > { %v2907_v29 = vld [vmem:[%s4306_s3] ss:$0 sm:$0xff] (%p404_p13)  ;;  %s2909_s26 = smul.u32 (%p404_p13), 192, %s3880_s18  ;;  %v614_v33 = vld [vmem:[#allocation3 + $0x18] sm:$0xff] (%p404_p13)  ;;  %v620_v46 = vld [vmem:[#allocation3 + $0x48] sm:$0xff] (%p404_p13) }
 0x131   : > { %v634_v30 = vadd.f32 (%p404_p13), %v2907_v29, %v611_v27  ;;  %v635_v31 = vadd.f32 (%p404_p13), %v2907_v29, %v612_v28  ;;  %v636_v35 = vadd.f32 (%p404_p13), %v2907_v29, %v613_v32  ;;  %v637_v36 = vadd.f32 (%p404_p13), %v2907_v29, %v614_v33  ;;  %v619_v45 = vld [vmem:[#allocation3 + $0x40] sm:$0xff] (%p404_p13)  ;;  %v621_v47 = vld [vmem:[#allocation3 + $0x50] sm:$0xff] (%p404_p13)  ;;  %v622_v52 = vld [vmem:[#allocation3 + $0x58] sm:$0xff] (%p404_p13) }
 0x132   : > { %v617_v39 = vld [vmem:[#allocation3 + $0x30] sm:$0xff] (%p404_p13)  ;;  %v642_v57 = vadd.f32 (%p404_p13), %v2907_v29, %v619_v45  ;;  %v643_v61 = vadd.f32 (%p404_p13), %v2907_v29, %v620_v46  ;;  %v644_v62 = vadd.f32 (%p404_p13), %v2907_v29, %v621_v47  ;;  %s2797_s27 = scalar_lea.vmem (%p404_p13), [#allocation2], %s2909_s26  ;;  %v645_v3 = vadd.f32 (%p404_p13), %v2907_v29, %v622_v52 }
 0x133   : > { %v615_v34 = vld [vmem:[#allocation3 + $0x20] sm:$0xff] (%p404_p13)  ;;  %v650_v41 = vmax.f32 (%p404_p13), %v634_v30, 0.0  ;;  %v651_v42 = vmax.f32 (%p404_p13), %v635_v31, 0.0  ;;  %v640_v44 = vadd.f32 (%p404_p13), %v2907_v29, %v617_v39  ;;  %v652_v48 = vmax.f32 (%p404_p13), %v636_v35, 0.0  ;;  %v625_v63 = vld [vmem:[#allocation3 + $0x70] sm:$0xff] (%p404_p13) }
 0x134   : > { %v638_v38 = vadd.f32 (%p404_p13), %v2907_v29, %v615_v34  ;;  %v618_v40 = vld [vmem:[#allocation3 + $0x38] sm:$0xff] (%p404_p13)  ;;  %v653_v49 = vmax.f32 (%p404_p13), %v637_v36, 0.0  ;;  %v623_v53 = vld [vmem:[#allocation3 + $0x60] sm:$0xff] (%p404_p13)  ;;  %v658_v2 = vmax.f32 (%p404_p13), %v642_v57, 0.0  ;;  %v659_v6 = vmax.f32 (%p404_p13), %v643_v61, 0.0 }
 0x135   : > { %v616_v37 = vld [vmem:[#allocation3 + $0x28] sm:$0xff] (%p404_p13)  ;;  %v641_v51 = vadd.f32 (%p404_p13), %v2907_v29, %v618_v40  ;;  %v666_v54 = vpack.c.bf16 (%p404_p13), %v651_v42, %v650_v41  ;;  %v656_v56 = vmax.f32 (%p404_p13), %v640_v44, 0.0  ;;  %v626_v0 = vld [vmem:[#allocation3 + $0x78] sm:$0xff] (%p404_p13)  ;;  %v646_v4 = vadd.f32 (%p404_p13), %v2907_v29, %v623_v53 }
 0x136   : > { %v639_v43 = vadd.f32 %v2907_v29, %v616_v37  ;;  %v654_v50 = vmax.f32 %v638_v38, 0.0  ;;  %v624_v58 = vld [vmem:[#allocation3 + $0x68] sm:$0xff]  ;;  %v667_v59 = vpack.c.bf16 %v653_v49, %v652_v48  ;;  %v660_v7 = vmax.f32 %v644_v62, 0.0 }
 0x137   : > { %v657_v60 = vmax.f32 %v641_v51, 0.0  ;;  %2910 = vst [vmem:[%s2797_s27 + $0x38] sm:$0xff] %v666_v54  ;;  %v647_v8 = vadd.f32 %v2907_v29, %v624_v58  ;;  %v661_v9 = vmax.f32 %v645_v3, 0.0  ;;  %v662_v10 = vmax.f32 %v646_v4, 0.0 }
 0x138   : > { %v655_v55 = vmax.f32 %v639_v43, 0.0  ;;  %2911 = vst [vmem:[%s2797_s27 + $0x50] sm:$0xff] %v667_v59  ;;  %v648_v11 = vadd.f32 %v2907_v29, %v625_v63  ;;  %v649_v12 = vadd.f32 %v2907_v29, %v626_v0  ;;  %v670_v13 = vpack.c.bf16 %v659_v6, %v658_v2 }
 0x139   : > { %v669_v5 = vpack.c.bf16 %v657_v60, %v656_v56  ;;  %v663_v14 = vmax.f32 %v647_v8, 0.0  ;;  %v671_v15 = vpack.c.bf16 %v661_v9, %v660_v7 }
 0x13a   : > { %v668_v1 = vpack.c.bf16 %v655_v55, %v654_v50  ;;  %v664_v16 = vmax.f32 %v648_v11, 0.0  ;;  %v665_v17 = vmax.f32 %v649_v12, 0.0  ;;  %2914 = vst [vmem:[%s2797_s27 + $0x98] sm:$0xff] %v670_v13 }
 0x13b   : > { %2913 = vst [vmem:[%s2797_s27 + $0x80] sm:$0xff] %v669_v5  ;;  %v672_v18 = vpack.c.bf16 %v663_v14, %v662_v10  ;;  %2915 = vst [vmem:[%s2797_s27 + $0xb0] sm:$0xff] %v671_v15 }
 0x13c   : > { %2912 = vst [vmem:[%s2797_s27 + $0x68] sm:$0xff] %v668_v1  ;;  %v673_v19 = vpack.c.bf16 %v665_v17, %v664_v16 }
 0x13d   : > { %2916 = vst [vmem:[%s2797_s27 + $0xc8] sm:$0xff] %v672_v18 }
 0x13e   : > { %2917 = vst [vmem:[%s2797_s27 + $0xe0] sm:$0xff] %v673_v19 }
 0x13f PF: > { %p687_p1 = scmp.ge.s32.totalorder %s3880_s18, 1 }
 0x140   : > { %v3754_v20 = vld [vmem:[#allocation6 + $0x40] sm:$0xff] (%p687_p1)   ;;  %v3756_v22 = vld [vmem:[#allocation6 + $0x48] sm:$0xff] (%p687_p1)   ;;  %v3758_v24 = vld [vmem:[#allocation6 + $0x50] sm:$0xff] (%p687_p1)   ;;  %s3084_s18 = smul.u32 (%p687_p1), 192, %s4008_s17  ;;  %vm729_vm2 = vcmask (%p687_p1), 1040384   ;;  %vm1125_vm3 = vcmask (%p687_p1), 1046528  }
 0x141   : > { %691 = sbr.rel (!%p687_p1) target bundleno = 710 (0x2c6), region = 56  ;;  %v3755_v21 = vld [vmem:[#allocation6 + $0x100] sm:$0xff] (%p687_p1)   ;;  %3256 = vmatprep.subr.bf16.mxu1 (%p687_p1), %v3754_v20  ;;  %v3757_v23 = vld [vmem:[#allocation6 + $0x108] sm:$0xff] (%p687_p1)   ;;  %v3759_v25 = vld [vmem:[#allocation6 + $0x110] sm:$0xff] (%p687_p1)   ;;  %vm2700_vm4 = vcmask (%p687_p1), 64512  }
 0x142   : > { %3384 = vmatprep.subr.bf16.mxu0 (%p687_p1), %v3755_v21  ;;  %3257 = vmatpush3.bf16.msra.mxu1 (%p687_p1), %v3754_v20  ;;  %v3760_v26 = vld [vmem:[#allocation6 + $0x58] sm:$0xff] (%p687_p1)   ;;  %v3762_v28 = vld [vmem:[#allocation6 + $0x60] sm:$0xff] (%p687_p1)   ;;  %v3764_v30 = vld [vmem:[#allocation6 + $0x68] sm:$0xff] (%p687_p1)   ;;  %s4058_s28 = scalar_lea.vmem (%p687_p1), [#allocation2], %s3084_s18 }
 0x143   : > { %3385 = vmatpush3.bf16.msra.mxu0 (%p687_p1), %v3755_v21  ;;  %3258 = vmatprep.subr.bf16.mxu1 (%p687_p1), %v3756_v22  ;;  %v3761_v27 = vld [vmem:[#allocation6 + $0x118] sm:$0xff] (%p687_p1)   ;;  %v3763_v29 = vld [vmem:[#allocation6 + $0x120] sm:$0xff] (%p687_p1)   ;;  %v3765_v33 = vld [vmem:[#allocation6 + $0x128] sm:$0xff] (%p687_p1)  }
 0x144   : > { %3386 = vmatprep.subr.bf16.mxu0 (%p687_p1), %v3757_v23  ;;  %v3766_v34 = vld [vmem:[#allocation6 + $0x70] sm:$0xff] (%p687_p1)   ;;  %v3768_v36 = vld [vmem:[#allocation6 + $0x78] sm:$0xff] (%p687_p1)   ;;  %v3770_v38 = vld [vmem:[#allocation6] sm:$0xff] (%p687_p1)  }
 0x145   : > { %v778_v31 = vld [vmem:[%s4058_s28 + $0x8] sm:$0xff] (%p687_p1)  ;;  %v2973_v32 = vld [vmem:[%s4058_s28 + $0x38] sm:$0xff] (%p687_p1)  ;;  %v3767_v35 = vld [vmem:[#allocation6 + $0x130] sm:$0xff] (%p687_p1)  }
 0x146   : > { %3259 = vmatpush3.bf16.msra.mxu1 (%p687_p1), %v3756_v22  ;;  %3272 = vmatprep.mubr.bf16.mxu1 (%p687_p1), %v778_v31  ;;  %v3769_v37 = vld [vmem:[#allocation6 + $0x138] sm:$0xff] (%p687_p1)   ;;  %v3771_v39 = vld [vmem:[#allocation6 + $0x140] sm:$0xff] (%p687_p1)   ;;  %v2974_v41 = vld [vmem:[%s4058_s28 + $0x50] sm:$0xff] (%p687_p1) }
 0x147   : > { %3387 = vmatpush3.bf16.msra.mxu0 (%p687_p1), %v3757_v23  ;;  %3260 = vmatprep.subr.bf16.mxu1 (%p687_p1), %v3758_v24  ;;  %v779_v40 = vld [vmem:[%s4058_s28 + $0x20] sm:$0xff] (%p687_p1)  ;;  %v3772_v42 = vld [vmem:[#allocation6 + $0x8] sm:$0xff] (%p687_p1)   ;;  %v3774_v45 = vld [vmem:[#allocation6 + $0x10] sm:$0xff] (%p687_p1)  }
 0x148   : > { %3388 = vmatprep.subr.bf16.mxu0 %v3759_v25  ;;  %3400 = vmatprep.mubr.bf16.mxu0 %v2973_v32  ;;  %v3773_v43 = vld [vmem:[#allocation6 + $0x148] sm:$0xff]   ;;  %v3775_v46 = vld [vmem:[#allocation6 + $0x150] sm:$0xff]   ;;  %v4069_v47 = vld [vmem:[%s4058_s28 + $0x80] sm:$0xff] }
 0x149   : > { %v4065_v44 = vld [vmem:[%s4058_s28 + $0x68] sm:$0xff]  ;;  %v3776_v48 = vld [vmem:[#allocation6 + $0x18] sm:$0xff]   ;;  %v3778_v51 = vld [vmem:[#allocation6 + $0x20] sm:$0xff]  }
 0x14a   : > { %3261 = vmatpush3.bf16.msra.mxu1 %v3758_v24  ;;  %v3777_v49 = vld [vmem:[#allocation6 + $0x158] sm:$0xff]   ;;  %v3779_v52 = vld [vmem:[#allocation6 + $0x160] sm:$0xff]   ;;  %v4078_v53 = vld [vmem:[%s4058_s28 + $0xb0] sm:$0xff] }
 0x14b   : > { %3389 = vmatpush3.bf16.msra.mxu0 %v3759_v25  ;;  %3262 = vmatprep.subr.bf16.mxu1 %v3760_v26  ;;  %v4073_v50 = vld [vmem:[%s4058_s28 + $0x98] sm:$0xff]  ;;  %v3780_v54 = vld [vmem:[#allocation6 + $0x28] sm:$0xff]   ;;  %v697_v57 = vld [vmem:[%s4058_s28] sm:$0x80] }
 0x14c   : > { %3390 = vmatprep.subr.bf16.mxu0 %v3761_v27  ;;  %v3781_v55 = vld [vmem:[#allocation6 + $0x168] sm:$0xff]   ;;  %v3782_v59 = vld [vmem:[#allocation6 + $0x30] sm:$0xff]   ;;  %v2989_v60 = vld [vmem:[%s4058_s28 + $0x38] sm:$0xfe]  ;;  %v730_v1 = vrot.slane %v697_v57, 7 }
 0x14d   : > { %v4083_v56 = vld [vmem:[%s4058_s28 + $0xc8] sm:$0xff]  ;;  %v2990_v61 = vld [vmem:[%s4058_s28 + $0x40] sm:$0x1]  ;;  %v3783_v62 = vld [vmem:[#allocation6 + $0x170] sm:$0xff]   ;;  %v1800_v4 = vrot.slane %v2989_v60, 1 }
 0x14e   : > { %3263 = vmatpush3.bf16.msra.mxu1 %v3760_v26  ;;  %v698_v58 = vld [vmem:[%s4058_s28 + $0x8] sm:$0x7f]  ;;  %v4092_v63 = vld [vmem:[%s4058_s28 + $0xe0] sm:$0xff]  ;;  %v3784_v0 = vld [vmem:[#allocation6 + $0x38] sm:$0xff]   ;;  %v1801_v5 = vrot.slane %v2990_v61, 1 }
 0x14f   : > { %3391 = vmatpush3.bf16.msra.mxu0 %v3761_v27  ;;  %3264 = vmatprep.subr.bf16.mxu1 %v3762_v28  ;;  %v731_v2 = vrot.slane %v698_v58, 7  ;;  %v3785_v3 = vld [vmem:[#allocation6 + $0x178] sm:$0xff]   ;;  %v700_v7 = vld [vmem:[%s4058_s28 + $0x20] sm:$0x7f]  ;;  %v2991_v8 = vld [vmem:[%s4058_s28 + $0x50] sm:$0xfe] }
 0x150   : > { %3392 = vmatprep.subr.bf16.mxu0 %v3763_v29  ;;  %v699_v6 = vld [vmem:[%s4058_s28 + $0x18] sm:$0x80]  ;;  %v2992_v9 = vld [vmem:[%s4058_s28 + $0x58] sm:$0x1]  ;;  %v1802_v12 = vsel %vm1125_vm3, %v1800_v4, %v1801_v5  ;;  %v734_v13 = vrot.slane %v700_v7, 7  ;;  %v3786_v14 = vld [vmem:[#allocation6 + $0x80] sm:$0xff]  }
 0x151   : > { %v732_v10 = vsel %vm729_vm2, %v730_v1, %v731_v2  ;;  %v733_v11 = vrot.slane %v699_v6, 7  ;;  %v701_v15 = vld [vmem:[%s4058_s28 + $0x30] sm:$0x80]  ;;  %v702_v16 = vld [vmem:[%s4058_s28 + $0x38] sm:$0x7f]  ;;  %v1803_v17 = vrot.slane %v2991_v8, 1 }
 0x152   : > { %3265 = vmatpush3.bf16.msra.mxu1 %v3762_v28  ;;  %v1804_v18 = vrot.slane %v2992_v9, 1  ;;  %v2993_v19 = vld [vmem:[%s4058_s28 + $0x68] sm:$0xfe]  ;;  %v2994_v20 = vld [vmem:[%s4058_s28 + $0x70] sm:$0x1]  ;;  %v3787_v21 = vld [vmem:[#allocation6 + $0x180] sm:$0xff]  }
 0x153   : > { %3393 = vmatpush3.bf16.msra.mxu0 %v3763_v29  ;;  %3266 = vmatprep.subr.bf16.mxu1 %v3764_v30  ;;  %v3788_v22 = vld [vmem:[#allocation6 + $0x88] sm:$0xff]   ;;  %v736_v23 = vrot.slane %v701_v15, 7  ;;  %v737_v24 = vrot.slane %v702_v16, 7  ;;  %v735_v25 = vsel %vm729_vm2, %v733_v11, %v734_v13  ;;  %v1806_v27 = vrot.slane %v2993_v19, 1  ;;  %v707_v58 = vld [vmem:[%s4058_s28 + $0x78] sm:$0x80] }
 0x154   : > { %3394 = vmatprep.subr.bf16.mxu0 %v3765_v33  ;;  %v3789_v26 = vld [vmem:[#allocation6 + $0x188] sm:$0xff]   ;;  %v1807_v28 = vrot.slane %v2994_v20, 1  ;;  %v1805_v31 = vsel %vm1125_vm3, %v1803_v17, %v1804_v18  ;;  %v2999_v61 = vld [vmem:[%s4058_s28 + $0xb0] sm:$0xfe]  ;;  %v745_v1 = vrot.slane %v707_v58, 7  ;;  %v3794_v4 = vld [vmem:[#allocation6 + $0xa0] sm:$0xff]  }
 0x155   : > { %v703_v29 = vld [vmem:[%s4058_s28 + $0x48] sm:$0x80]  ;;  %v709_v5 = vld [vmem:[%s4058_s28 + $0x90] sm:$0x80]  ;;  %v710_v6 = vld [vmem:[%s4058_s28 + $0x98] sm:$0x7f] }
 0x156   : > { %3267 = vmatpush3.bf16.msra.mxu1 %v3764_v30  ;;  %v704_v30 = vld [vmem:[%s4058_s28 + $0x50] sm:$0x7f]  ;;  %v1815_v7 = vrot.slane %v2999_v61, 1  ;;  %v3001_v9 = vld [vmem:[%s4058_s28 + $0xc8] sm:$0xfe]  ;;  %v3795_v11 = vld [vmem:[#allocation6 + $0x1a0] sm:$0xff]  }
 0x157   : > { %3395 = vmatpush3.bf16.msra.mxu0 %v3765_v33  ;;  %3268 = vmatprep.subr.bf16.mxu1 %v3766_v34  ;;  %v2996_v33 = vld [vmem:[%s4058_s28 + $0x88] sm:$0x1]  ;;  %v748_v13 = vrot.slane %v709_v5, 7  ;;  %v1818_v17 = vrot.slane %v3001_v9, 1  ;;  %v711_v19 = vld [vmem:[%s4058_s28 + $0xa8] sm:$0x80] }
 0x158   : > { %3396 = vmatprep.subr.bf16.mxu0 %v3767_v35  ;;  %v3797_v16 = vld [vmem:[#allocation6 + $0x1a8] sm:$0xff]   ;;  %v712_v20 = vld [vmem:[%s4058_s28 + $0xb0] sm:$0x7f]  ;;  %v1097_v58 = vld [vmem:[%s4058_s28 + $0x38] sm:$0xfe] }
 0x159   : > { %v1099_v9 = vld [vmem:[%s4058_s28 + $0x50] sm:$0xfe] }
 0x15a   : > { %3269 = vmatpush3.bf16.msra.mxu1 %v3766_v34  ;;  %v738_v34 = vsel %vm729_vm2, %v736_v23, %v737_v24  ;;  %v3004_v23 = vld [vmem:[%s4058_s28 + $0xe8] sm:$0x1] }
 0x15b   : > { %3397 = vmatpush3.bf16.msra.mxu0 %v3767_v35  ;;  %3270 = vmatprep.subr.bf16.mxu1 %v3768_v36  ;;  %v739_v35 = vrot.slane %v703_v29, 7  ;;  %v1093_v29 = vld [vmem:[%s4058_s28 + $0x8] sm:$0xfe] }
 0x15c   : > { %3398 = vmatprep.subr.bf16.mxu0 %v3769_v37 }
 0x15e   : > { %3271 = vmatpush3.bf16.msra.mxu1 %v3768_v36  ;;  %v1808_v36 = vsel %vm1125_vm3, %v1806_v27, %v1807_v28  ;;  %v752_v27 = vrot.slane %v712_v20, 7  ;;  %v3798_v28 = vld [vmem:[#allocation6 + $0xb0] sm:$0xff]  }
 0x15f   : > { %3399 = vmatpush3.bf16.msra.mxu0 %v3769_v37  ;;  %3288 = vmatprep.subr.bf16.mxu1 %v3770_v38  ;;  %v740_v37 = vrot.slane %v704_v30, 7  ;;  %v1094_v30 = vld [vmem:[%s4058_s28 + $0x10] sm:$0x1] }
 0x160   : > { %3416 = vmatprep.subr.bf16.mxu0 %v3771_v39  ;;  %v1102_v20 = vld [vmem:[%s4058_s28 + $0x70] sm:$0x1] }
 0x161   : > { %3273 = vmatmul.mubr.bf16.vlgmr.msra.gmra.mrb[0].mxu1 %v779_v40  ;;  %v706_v40 = vld [vmem:[%s4058_s28 + $0x68] sm:$0x7f] }
 0x162   : > { %3401 = vmatmul.mubr.bf16.vlgmr.msra.gmra.mrb[0].mxu0 %v2974_v41  ;;  %3289 = vmatpush3.bf16.msra.mxu1 %v3770_v38  ;;  %v3790_v38 = vld [vmem:[#allocation6 + $0x90] sm:$0xff]  }
 0x163   : > { %3417 = vmatpush3.bf16.msra.mxu0 %v3771_v39  ;;  %3290 = vmatprep.subr.bf16.mxu1 %v3772_v42  ;;  %v705_v39 = vld [vmem:[%s4058_s28 + $0x60] sm:$0x80] }
 0x164   : > { %3418 = vmatprep.subr.bf16.mxu0 %v3773_v43  ;;  %3276 = vmatprep.mubr.bf16.mxu1 %v2973_v32  ;;  %v2995_v32 = vld [vmem:[%s4058_s28 + $0x80] sm:$0xfe] }
 0x165   : > { %3404 = vmatprep.mubr.bf16.mxu0 %v4065_v44 }
 0x166   : > { %3291 = vmatpush3.bf16.msra.mxu1 %v3772_v42  ;;  %v1810_v42 = vrot.slane %v2996_v33, 1  ;;  %v3015_v33 = vld [vmem:[%s4058_s28 + $0x60] sm:$0x80] }
 0x167   : > { %3419 = vmatpush3.bf16.msra.mxu0 %v3773_v43  ;;  %3292 = vmatprep.subr.bf16.mxu1 %v3774_v45  ;;  %v2997_v43 = vld [vmem:[%s4058_s28 + $0x98] sm:$0xfe] }
 0x168   : > { %3420 = vmatprep.subr.bf16.mxu0 %v3775_v46 }
 0x169   : > { %3277 = vmatmul.mubr.bf16.gmra.mrb[4].mxu1 %v2974_v41  ;;  %v1809_v41 = vrot.slane %v2995_v32, 1  ;;  %v1822_v32 = vrot.slane %v3004_v23, 1  ;;  %v3023_v23 = vld [vmem:[%s4058_s28 + $0xc0] sm:$0x80] }
 0x16a   : > { %3405 = vmatmul.mubr.bf16.gmra.mrb[4].mxu0 %v4069_v47  ;;  %3293 = vmatpush3.bf16.msra.mxu1 %v3774_v45  ;;  %v2998_v45 = vld [vmem:[%s4058_s28 + $0xa0] sm:$0x1] }
 0x16b   : > { %3421 = vmatpush3.bf16.msra.mxu0 %v3775_v46  ;;  %3294 = vmatprep.subr.bf16.mxu1 %v3776_v48  ;;  %v3791_v46 = vld [vmem:[#allocation6 + $0x190] sm:$0xff]   ;;  %v1813_v57 = vrot.slane %v2998_v45, 1  ;;  %v1811_v60 = vsel %vm1125_vm3, %v1809_v41, %v1810_v42  ;;  %v2046_v41 = vrot.slane %v3015_v33, 7  ;;  %v1096_v45 = vld [vmem:[%s4058_s28 + $0x28] sm:$0x1] }
 0x16c   : > { %3422 = vmatprep.subr.bf16.mxu0 %v3777_v49  ;;  %3280 = vmatprep.mubr.bf16.mxu1 %v4065_v44 }
 0x16d   : > { %3408 = vmatprep.mubr.bf16.mxu0 %v4073_v50 }
 0x16e   : > { %3295 = vmatpush3.bf16.msra.mxu1 %v3776_v48  ;;  %v3792_v48 = vld [vmem:[#allocation6 + $0x98] sm:$0xff]  }
 0x16f   : > { %3423 = vmatpush3.bf16.msra.mxu0 %v3777_v49  ;;  %3296 = vmatprep.subr.bf16.mxu1 %v3778_v51  ;;  %v742_v49 = vrot.slane %v705_v39, 7 }
 0x170   : > { %3424 = vmatprep.subr.bf16.mxu0 %v3779_v52 }
 0x171   : > { %3281 = vmatmul.mubr.bf16.gmra.mrb[8].mxu1 %v4069_v47 }
 0x172   : > { %3409 = vmatmul.mubr.bf16.gmra.mrb[8].mxu0 %v4078_v53  ;;  %3297 = vmatpush3.bf16.msra.mxu1 %v3778_v51  ;;  %v743_v51 = vrot.slane %v706_v40, 7  ;;  %v3801_v40 = vld [vmem:[#allocation6 + $0x1b8] sm:$0xff]  }
 0x173   : > { %3425 = vmatpush3.bf16.msra.mxu0 %v3779_v52  ;;  %3298 = vmatprep.subr.bf16.mxu1 %v3780_v54  ;;  %v741_v52 = vsel %vm729_vm2, %v739_v35, %v740_v37  ;;  %v3799_v35 = vld [vmem:[#allocation6 + $0x1b0] sm:$0xff]   ;;  %v1126_v37 = vrot.slane %v1093_v29, 1  ;;  %v3808_v29 = vld [vmem:[#allocation6 + $0xd8] sm:$0xff]  }
 0x174   : > { %3426 = vmatprep.subr.bf16.mxu0 %v3781_v55  ;;  %3284 = vmatprep.mubr.bf16.mxu1 %v4073_v50 }
 0x175   : > { %3412 = vmatprep.mubr.bf16.mxu0 %v4083_v56 }
 0x176   : > { %3299 = vmatpush3.bf16.msra.mxu1 %v3780_v54  ;;  %v3793_v54 = vld [vmem:[#allocation6 + $0x198] sm:$0xff]  }
 0x177   : > { %3427 = vmatpush3.bf16.msra.mxu0 %v3781_v55  ;;  %3300 = vmatprep.subr.bf16.mxu1 %v3782_v59  ;;  %v1812_v55 = vrot.slane %v2997_v43, 1  ;;  %v1095_v43 = vld [vmem:[%s4058_s28 + $0x20] sm:$0xfe] }
 0x178   : > { %3428 = vmatprep.subr.bf16.mxu0 %v3783_v62 }
 0x179   : > { %3285 = vmatmul.mubr.bf16.gmra.mrb[12].mxu1 %v4078_v53  ;;  %v1814_v2 = vsel %vm1125_vm3, %v1812_v55, %v1813_v57  ;;  %v1130_v55 = vrot.slane %v1096_v45, 1  ;;  %v3802_v57 = vld [vmem:[#allocation6 + $0xc0] sm:$0xff]  }
 0x17a   : > { %3413 = vmatmul.mubr.bf16.gmra.mrb[12].mxu0 %v4092_v63  ;;  %3301 = vmatpush3.bf16.msra.mxu1 %v3782_v59  ;;  %v708_v59 = vld [vmem:[%s4058_s28 + $0x80] sm:$0x7f] }
 0x17b   : > { %3429 = vmatpush3.bf16.msra.mxu0 %v3783_v62  ;;  %3302 = vmatprep.subr.bf16.mxu1 %v3784_v0  ;;  %v3000_v62 = vld [vmem:[%s4058_s28 + $0xb8] sm:$0x1]  ;;  %v1106_v45 = vld [vmem:[%s4058_s28 + $0xa0] sm:$0x1] }
 0x17c   : > { %3430 = vmatprep.subr.bf16.mxu0 %v3785_v3  ;;  %3304 = vmatprep.mubr.bf16.mxu1 %v732_v10  ;;  %v1816_v8 = vrot.slane %v3000_v62, 1  ;;  %v3002_v10 = vld [vmem:[%s4058_s28 + $0xd0] sm:$0x1]  ;;  %v3019_v62 = vld [vmem:[%s4058_s28 + $0x90] sm:$0x80] }
 0x17d   : > { %3432 = vmatprep.mubr.bf16.mxu0 %v1802_v12  ;;  %v3796_v12 = vld [vmem:[#allocation6 + $0xa8] sm:$0xff]   ;;  %v1819_v18 = vrot.slane %v3002_v10, 1  ;;  %v1100_v10 = vld [vmem:[%s4058_s28 + $0x58] sm:$0x1] }
 0x17e   : > { %3303 = vmatpush3.bf16.msra.mxu1 %v3784_v0  ;;  %v744_v0 = vsel %vm729_vm2, %v742_v49, %v743_v51  ;;  %v3018_v49 = vld [vmem:[%s4058_s28 + $0x80] sm:$0x7f] }
 0x17f   : > { %3431 = vmatpush3.bf16.msra.mxu0 %v3785_v3  ;;  %3320 = vmatprep.subr.bf16.mxu1 %v3786_v14  ;;  %v746_v3 = vrot.slane %v708_v59, 7  ;;  %v1098_v59 = vld [vmem:[%s4058_s28 + $0x40] sm:$0x1]  ;;  %v2050_v61 = vrot.slane %v3018_v49, 7  ;;  %v3027_v49 = vld [vmem:[%s4058_s28 + $0xf0] sm:$0x80] }
 0x180   : > { %3448 = vmatprep.subr.bf16.mxu0 %v3787_v21 }
 0x181   : > { %3305 = vmatmul.mubr.bf16.vlgmr.msra.gmra.mrb[0].mxu1 %v735_v25  ;;  %v747_v15 = vsel %vm729_vm2, %v745_v1, %v746_v3  ;;  %v751_v25 = vrot.slane %v711_v19, 7  ;;  %v3803_v1 = vld [vmem:[#allocation6 + $0x1c0] sm:$0xff]   ;;  %v1132_v3 = vrot.slane %v1097_v58, 1  ;;  %v1101_v19 = vld [vmem:[%s4058_s28 + $0x68] sm:$0xfe]  ;;  %v2064_v58 = vrot.slane %v3027_v49, 7 }
 0x182   : > { %3433 = vmatmul.mubr.bf16.vlgmr.msra.gmra.mrb[0].mxu0 %v1805_v31  ;;  %3321 = vmatpush3.bf16.msra.mxu1 %v3786_v14  ;;  %v749_v14 = vrot.slane %v710_v6, 7  ;;  %v3805_v6 = vld [vmem:[#allocation6 + $0x1c8] sm:$0xff]  }
 0x183   : > { %3449 = vmatpush3.bf16.msra.mxu0 %v3787_v21  ;;  %3322 = vmatprep.subr.bf16.mxu1 %v3788_v22  ;;  %v1817_v21 = vsel %vm1125_vm3, %v1815_v7, %v1816_v8  ;;  %v753_v39 = vsel %vm729_vm2, %v751_v25, %v752_v27  ;;  %v2052_v7 = vrot.slane %v3019_v62, 7  ;;  %v3807_v25 = vld [vmem:[#allocation6 + $0x1d0] sm:$0xff]   ;;  %v1139_v27 = vrot.slane %v1102_v20, 1  ;;  %v2962_v49 = vld [vmem:[%s4058_s28 + $0xc8] sm:$0x7f] }
 0x184   : > { %3450 = vmatprep.subr.bf16.mxu0 %v3789_v26  ;;  %3308 = vmatprep.mubr.bf16.mxu1 %v738_v34  ;;  %v750_v24 = vsel %vm729_vm2, %v748_v13, %v749_v14  ;;  %v3016_v34 = vld [vmem:[%s4058_s28 + $0x68] sm:$0x7f]  ;;  %v3022_v13 = vld [vmem:[%s4058_s28 + $0xb0] sm:$0x7f] }
 0x185   : > { %3436 = vmatprep.mubr.bf16.mxu0 %v1808_v36  ;;  %v3800_v36 = vld [vmem:[#allocation6 + $0xb8] sm:$0xff]   ;;  %v2047_v42 = vrot.slane %v3016_v34, 7  ;;  %v2952_v20 = vld [vmem:[%s4058_s28 + $0x50] sm:$0x7f] }
 0x186   : > { %3323 = vmatpush3.bf16.msra.mxu1 %v3788_v22  ;;  %v3003_v22 = vld [vmem:[%s4058_s28 + $0xe0] sm:$0xfe]  ;;  %v3809_v34 = vld [vmem:[#allocation6 + $0x1d8] sm:$0xff]  }
 0x187   : > { %3451 = vmatpush3.bf16.msra.mxu0 %v3789_v26  ;;  %3324 = vmatprep.subr.bf16.mxu1 %v3790_v38  ;;  %v1820_v26 = vsel %vm1125_vm3, %v1818_v17, %v1819_v18  ;;  %v1821_v31 = vrot.slane %v3003_v22, 1  ;;  %v1136_v17 = vrot.slane %v1100_v10, 1  ;;  %v3806_v18 = vld [vmem:[#allocation6 + $0xd0] sm:$0xff]   ;;  %v2056_v22 = vrot.slane %v3022_v13, 7 }
 0x188   : > { %3452 = vmatprep.subr.bf16.mxu0 %v3791_v46  ;;  %v3814_v10 = vld [vmem:[#allocation6 + $0xf0] sm:$0xff]  }
 0x189   : > { %3309 = vmatmul.mubr.bf16.gmra.mrb[4].mxu1 %v741_v52  ;;  %v1129_v52 = vrot.slane %v1095_v43, 1  ;;  %v1105_v43 = vld [vmem:[%s4058_s28 + $0x98] sm:$0xfe]  ;;  %v3815_v13 = vld [vmem:[#allocation6 + $0x1f0] sm:$0xff]  }
 0x18a   : > { %3437 = vmatmul.mubr.bf16.gmra.mrb[4].mxu0 %v1811_v60  ;;  %3325 = vmatpush3.bf16.msra.mxu1 %v3790_v38  ;;  %v1127_v38 = vrot.slane %v1094_v30, 1  ;;  %v2058_v30 = vrot.slane %v3023_v23, 7 }
 0x18b   : > { %3453 = vmatpush3.bf16.msra.mxu0 %v3791_v46  ;;  %3326 = vmatprep.subr.bf16.mxu1 %v3792_v48  ;;  %v1823_v46 = vsel %vm1125_vm3, %v1821_v31, %v1822_v32  ;;  %v1131_v5 = vsel %vm1125_vm3, %v1129_v52, %v1130_v55  ;;  %v1103_v32 = vld [vmem:[%s4058_s28 + $0x80] sm:$0xfe]  ;;  %v1145_v55 = vrot.slane %v1106_v45, 1 }
 0x18c   : > { %3454 = vmatprep.subr.bf16.mxu0 %v3793_v54  ;;  %3312 = vmatprep.mubr.bf16.mxu1 %v744_v0  ;;  %v1128_v51 = vsel %vm1125_vm3, %v1126_v37, %v1127_v38  ;;  %v3020_v0 = vld [vmem:[%s4058_s28 + $0x98] sm:$0x7f]  ;;  %v3026_v37 = vld [vmem:[%s4058_s28 + $0xe0] sm:$0x7f] }
 0x18d   : > { %3440 = vmatprep.mubr.bf16.mxu0 %v1814_v2  ;;  %v3804_v2 = vld [vmem:[#allocation6 + $0xc8] sm:$0xff]   ;;  %v2053_v8 = vrot.slane %v3020_v0, 7  ;;  %v3811_v52 = vld [vmem:[#allocation6 + $0x1e0] sm:$0xff]  }
 0x18e   : > { %3327 = vmatpush3.bf16.msra.mxu1 %v3792_v48  ;;  %v3017_v48 = vld [vmem:[%s4058_s28 + $0x78] sm:$0x80]  ;;  %v3812_v0 = vld [vmem:[#allocation6 + $0xe8] sm:$0xff]  }
 0x18f   : > { %3455 = vmatpush3.bf16.msra.mxu0 %v3793_v54  ;;  %3328 = vmatprep.subr.bf16.mxu1 %v3794_v4  ;;  %v2048_v54 = vsel %vm729_vm2, %v2046_v41, %v2047_v42  ;;  %v2049_v60 = vrot.slane %v3017_v48, 7  ;;  %v3810_v42 = vld [vmem:[#allocation6 + $0xe0] sm:$0xff]   ;;  %v2062_v48 = vrot.slane %v3026_v37, 7  ;;  %v2958_v37 = vld [vmem:[%s4058_s28 + $0x98] sm:$0x7f] }
 0x190   : > { %3456 = vmatprep.subr.bf16.mxu0 %v3795_v11 }
 0x191   : > { %3313 = vmatmul.mubr.bf16.gmra.mrb[8].mxu1 %v747_v15  ;;  %v1135_v15 = vrot.slane %v1099_v9, 1  ;;  %v2950_v9 = vld [vmem:[%s4058_s28 + $0x38] sm:$0x7f] }
 0x192   : > { %3441 = vmatmul.mubr.bf16.gmra.mrb[8].mxu0 %v1817_v21  ;;  %3329 = vmatpush3.bf16.msra.mxu1 %v3794_v4  ;;  %v1133_v4 = vrot.slane %v1098_v59, 1 }
 0x193   : > { %3457 = vmatpush3.bf16.msra.mxu0 %v3795_v11  ;;  %3330 = vmatprep.subr.bf16.mxu1 %v3796_v12  ;;  %v2051_v11 = vsel %vm729_vm2, %v2049_v60, %v2050_v61  ;;  %v1107_v60 = vld [vmem:[%s4058_s28 + $0xb0] sm:$0xfe]  ;;  %v1108_v61 = vld [vmem:[%s4058_s28 + $0xb8] sm:$0x1] }
 0x194   : > { %3458 = vmatprep.subr.bf16.mxu0 %v3797_v16  ;;  %3316 = vmatprep.mubr.bf16.mxu1 %v750_v24  ;;  %v1134_v14 = vsel %vm1125_vm3, %v1132_v3, %v1133_v4  ;;  %v3024_v24 = vld [vmem:[%s4058_s28 + $0xc8] sm:$0x7f]  ;;  %v3030_v3 = vld [vmem:[%s4058_s28 + $0x110] sm:$0x7f] }
 0x195   : > { %3444 = vmatprep.mubr.bf16.mxu0 %v1820_v26  ;;  %v1138_v26 = vrot.slane %v1101_v19, 1  ;;  %v2059_v31 = vrot.slane %v3024_v24, 7  ;;  %v2951_v19 = vld [vmem:[%s4058_s28 + $0x48] sm:$0x80]  ;;  %v1376_v24 = vrot.slane %v2952_v20, 7 }
 0x196   : > { %3331 = vmatpush3.bf16.msra.mxu1 %v3796_v12  ;;  %v3021_v12 = vld [vmem:[%s4058_s28 + $0xa8] sm:$0x80]  ;;  %v1375_v23 = vrot.slane %v2951_v19, 7 }
 0x197   : > { %3459 = vmatpush3.bf16.msra.mxu0 %v3797_v16  ;;  %3332 = vmatprep.subr.bf16.mxu1 %v3798_v28  ;;  %v2054_v16 = vsel %vm729_vm2, %v2052_v7, %v2053_v8  ;;  %v2055_v21 = vrot.slane %v3021_v12, 7  ;;  %v1140_v38 = vsel %vm1125_vm3, %v1138_v26, %v1139_v27  ;;  %v2949_v8 = vld [vmem:[%s4058_s28 + $0x30] sm:$0x80]  ;;  %v2068_v12 = vrot.slane %v3030_v3, 7  ;;  %v2954_v26 = vld [vmem:[%s4058_s28 + $0x68] sm:$0x7f] }
 0x198   : > { %3460 = vmatprep.subr.bf16.mxu0 %v3799_v35  ;;  %v3818_v27 = vld [vmem:[#allocation6 + $0x200] sm:$0xff]   ;;  %v3064_v3 = vld [vmem:[%s4058_s28 + $0xd0] sm:$0x1] }
 0x199   : > { %3317 = vmatmul.mubr.bf16.gmra.mrb[12].mxu1 %v753_v39  ;;  %v2057_v33 = vsel %vm729_vm2, %v2055_v21, %v2056_v22  ;;  %v1141_v39 = vrot.slane %v1103_v32, 1  ;;  %v3817_v21 = vld [vmem:[#allocation6 + $0x1f8] sm:$0xff]  }
 0x19a   : > { %3445 = vmatmul.mubr.bf16.gmra.mrb[12].mxu0 %v1823_v46  ;;  %3333 = vmatpush3.bf16.msra.mxu1 %v3798_v28  ;;  %v1137_v28 = vsel %vm1125_vm3, %v1135_v15, %v1136_v17  ;;  %v1373_v15 = vrot.slane %v2950_v9, 7  ;;  %v2955_v32 = vld [vmem:[%s4058_s28 + $0x78] sm:$0x80]  ;;  %v2487_v9 = vrot.slane %v3064_v3, 1 }
 0x19b   : > { %3461 = vmatpush3.bf16.msra.mxu0 %v3799_v35  ;;  %3334 = vmatprep.subr.bf16.mxu1 %v3800_v36  ;;  %v1104_v35 = vld [vmem:[%s4058_s28 + $0x88] sm:$0x1] }
 0x19c   : > { %3462 = vmatprep.subr.bf16.mxu0 %v3801_v40  ;;  %3336 = vmatprep.mubr.bf16.mxu1 %v1128_v51  ;;  %v1142_v41 = vrot.slane %v1104_v35, 1  ;;  %v3028_v51 = vld [vmem:[%s4058_s28 + $0xf8] sm:$0x7f] }
 0x19d   : > { %3464 = vmatprep.mubr.bf16.mxu0 %v2048_v54  ;;  %v1144_v54 = vrot.slane %v1105_v43, 1  ;;  %v2065_v59 = vrot.slane %v3028_v51, 7  ;;  %v2960_v43 = vld [vmem:[%s4058_s28 + $0xb0] sm:$0x7f]  ;;  %v3822_v51 = vld [vmem:[#allocation6 + $0x220] sm:$0xff]  }
 0x19e   : > { %3335 = vmatpush3.bf16.msra.mxu1 %v3800_v36  ;;  %v3025_v36 = vld [vmem:[%s4058_s28 + $0xd8] sm:$0x80] }
 0x19f   : > { %3463 = vmatpush3.bf16.msra.mxu0 %v3801_v40  ;;  %3352 = vmatprep.subr.bf16.mxu1 %v3802_v57  ;;  %v2060_v40 = vsel %vm729_vm2, %v2058_v30, %v2059_v31  ;;  %v2061_v46 = vrot.slane %v3025_v36, 7  ;;  %v1146_v4 = vsel %vm1125_vm3, %v1144_v54, %v1145_v55  ;;  %v2066_v7 = vsel %vm729_vm2, %v2064_v58, %v2065_v59  ;;  %v3819_v31 = vld [vmem:[#allocation6 + $0x208] sm:$0xff]   ;;  %v2957_v36 = vld [vmem:[%s4058_s28 + $0x90] sm:$0x80]  ;;  %v2964_v58 = vld [vmem:[%s4058_s28 + $0xe0] sm:$0x7f] }
 0x1a0   : > { %3480 = vmatprep.subr.bf16.mxu0 %v3803_v1  ;;  %v1377_v30 = vsel %vm729_vm2, %v1375_v23, %v1376_v24  ;;  %v1391_v54 = vrot.slane %v2962_v49, 7  ;;  %v3823_v55 = vld [vmem:[#allocation6 + $0x228] sm:$0xff]  }
 0x1a1   : > { %3337 = vmatmul.mubr.bf16.vlgmr.msra.gmra.mrb[0].mxu1 %v1131_v5  ;;  %v2063_v62 = vsel %vm729_vm2, %v2061_v46, %v2062_v48  ;;  %v1147_v5 = vrot.slane %v1107_v60, 1  ;;  %v1388_v46 = vrot.slane %v2960_v43, 7  ;;  %v2961_v48 = vld [vmem:[%s4058_s28 + $0xc0] sm:$0x80]  ;;  %v3045_v60 = vld [vmem:[%s4058_s28 + $0xf8] sm:$0xff] }
 0x1a2   : > { %3465 = vmatmul.mubr.bf16.vlgmr.msra.gmra.mrb[0].mxu0 %v2051_v11  ;;  %3353 = vmatpush3.bf16.msra.mxu1 %v3802_v57  ;;  %v1143_v57 = vsel %vm1125_vm3, %v1141_v39, %v1142_v41  ;;  %v1384_v39 = vrot.slane %v2957_v36, 7  ;;  %v3821_v41 = vld [vmem:[#allocation6 + $0x218] sm:$0xff]  }
 0x1a3   : > { %3481 = vmatpush3.bf16.msra.mxu0 %v3803_v1  ;;  %3354 = vmatprep.subr.bf16.mxu1 %v3804_v2  ;;  %v3813_v1 = vld [vmem:[#allocation6 + $0x1e8] sm:$0xff]  }
 0x1a4   : > { %3482 = vmatprep.subr.bf16.mxu0 %v3805_v6  ;;  %3340 = vmatprep.mubr.bf16.mxu1 %v1134_v14  ;;  %v1372_v14 = vrot.slane %v2949_v8, 7 }
 0x1a5   : > { %3468 = vmatprep.mubr.bf16.mxu0 %v2054_v16 }
 0x1a6   : > { %3355 = vmatpush3.bf16.msra.mxu1 %v3804_v2  ;;  %v3029_v2 = vld [vmem:[%s4058_s28 + $0x108] sm:$0x80]  ;;  %v1374_v22 = vsel %vm729_vm2, %v1372_v14, %v1373_v15  ;;  %v3067_v14 = vld [vmem:[%s4058_s28 + $0xf8] sm:$0xfe]  ;;  %v3068_v15 = vld [vmem:[%s4058_s28 + $0x100] sm:$0x1] }
 0x1a7   : > { %3483 = vmatpush3.bf16.msra.mxu0 %v3805_v6  ;;  %3356 = vmatprep.subr.bf16.mxu1 %v3806_v18  ;;  %v1148_v6 = vrot.slane %v1108_v61, 1  ;;  %v2067_v11 = vrot.slane %v3029_v2, 7  ;;  %v1394_v61 = vrot.slane %v2964_v58, 7  ;;  %v3063_v2 = vld [vmem:[%s4058_s28 + $0xc8] sm:$0xfe]  ;;  %v2492_v24 = vrot.slane %v3067_v14, 1 }
 0x1a8   : > { %3484 = vmatprep.subr.bf16.mxu0 %v3807_v25  ;;  %v2486_v8 = vrot.slane %v3063_v2, 1 }
 0x1a9   : > { %3341 = vmatmul.mubr.bf16.gmra.mrb[4].mxu1 %v1137_v28  ;;  %v1149_v16 = vsel %vm1125_vm3, %v1147_v5, %v1148_v6  ;;  %v2069_v17 = vsel %vm729_vm2, %v2067_v11, %v2068_v12  ;;  %v3046_v6 = vld [vmem:[%s4058_s28 + $0x110] sm:$0xff]  ;;  %v3065_v11 = vld [vmem:[%s4058_s28 + $0xe0] sm:$0xfe]  ;;  %v3066_v12 = vld [vmem:[%s4058_s28 + $0xe8] sm:$0x1] }
 0x1aa   : > { %3469 = vmatmul.mubr.bf16.gmra.mrb[4].mxu0 %v2057_v33  ;;  %3357 = vmatpush3.bf16.msra.mxu1 %v3806_v18  ;;  %v3816_v18 = vld [vmem:[#allocation6 + $0xf8] sm:$0xff]   ;;  %v2956_v33 = vld [vmem:[%s4058_s28 + $0x80] sm:$0x7f]  ;;  %v2488_v19 = vsel %vm1125_vm3, %v2486_v8, %v2487_v9  ;;  %v2489_v20 = vrot.slane %v3065_v11, 1 }
 0x1ab   : > { %3485 = vmatpush3.bf16.msra.mxu0 %v3807_v25  ;;  %3358 = vmatprep.subr.bf16.mxu1 %v3808_v29  ;;  %v2953_v25 = vld [vmem:[%s4058_s28 + $0x60] sm:$0x80]  ;;  %v1382_v35 = vrot.slane %v2956_v33, 7 }
 0x1ac   : > { %3486 = vmatprep.subr.bf16.mxu0 %v3809_v34  ;;  %3344 = vmatprep.mubr.bf16.mxu1 %v1140_v38  ;;  %v1378_v28 = vrot.slane %v2953_v25, 7  ;;  %v3820_v38 = vld [vmem:[#allocation6 + $0x210] sm:$0xff]   ;;  %v2493_v25 = vrot.slane %v3068_v15, 1 }
 0x1ad   : > { %3472 = vmatprep.mubr.bf16.mxu0 %v2060_v40  ;;  %v1385_v40 = vrot.slane %v2958_v37, 7 }
 0x1ae   : > { %3359 = vmatpush3.bf16.msra.mxu1 %v3808_v29  ;;  %v1379_v29 = vrot.slane %v2954_v26, 7 }
 0x1af   : > { %3487 = vmatpush3.bf16.msra.mxu0 %v3809_v34  ;;  %3360 = vmatprep.subr.bf16.mxu1 %v3810_v42  ;;  %v1386_v45 = vsel %vm729_vm2, %v1384_v39, %v1385_v40 }
 0x1b0   : > { %3488 = vmatprep.subr.bf16.mxu0 %v3811_v52  ;;  %v1380_v34 = vsel %vm729_vm2, %v1378_v28, %v1379_v29 }
 0x1b1   : > { %3345 = vmatmul.mubr.bf16.gmra.mrb[8].mxu1 %v1143_v57  ;;  %v2963_v57 = vld [vmem:[%s4058_s28 + $0xd8] sm:$0x80] }
 0x1b2   : > { %3473 = vmatmul.mubr.bf16.gmra.mrb[8].mxu0 %v2063_v62  ;;  %3361 = vmatpush3.bf16.msra.mxu1 %v3810_v42  ;;  %v2959_v42 = vld [vmem:[%s4058_s28 + $0xa8] sm:$0x80] }
 0x1b3   : > { %3489 = vmatpush3.bf16.msra.mxu0 %v3811_v52  ;;  %3362 = vmatprep.subr.bf16.mxu1 %v3812_v0  ;;  %v1390_v52 = vrot.slane %v2961_v48, 7  ;;  %v3055_v62 = vld [vmem:[%s4058_s28 + $0x68] sm:$0xfe] }
 0x1b4   : > { %3490 = vmatprep.subr.bf16.mxu0 %v3813_v1  ;;  %3348 = vmatprep.mubr.bf16.mxu1 %v1146_v4 }
 0x1b5   : > { %3476 = vmatprep.mubr.bf16.mxu0 %v2066_v7  ;;  %v1392_v59 = vsel %vm729_vm2, %v1390_v52, %v1391_v54  ;;  %v3825_v7 = vld [vmem:[#allocation6 + $0x238] sm:$0xff]  }
 0x1b6   : > { %3363 = vmatpush3.bf16.msra.mxu1 %v3812_v0  ;;  %v3056_v0 = vld [vmem:[%s4058_s28 + $0x70] sm:$0x1] }
 0x1b7   : > { %3491 = vmatpush3.bf16.msra.mxu0 %v3813_v1  ;;  %3364 = vmatprep.subr.bf16.mxu1 %v3814_v10  ;;  %v3824_v1 = vld [vmem:[#allocation6 + $0x230] sm:$0xff]   ;;  %v2475_v4 = vrot.slane %v3056_v0, 1 }
 0x1b8   : > { %3492 = vmatprep.subr.bf16.mxu0 %v3815_v13 }
 0x1b9   : > { %3349 = vmatmul.mubr.bf16.gmra.mrb[12].mxu1 %v1149_v16 }
 0x1ba   : > { %3477 = vmatmul.mubr.bf16.gmra.mrb[12].mxu0 %v2069_v17  ;;  %3365 = vmatpush3.bf16.msra.mxu1 %v3814_v10  ;;  %v3057_v10 = vld [vmem:[%s4058_s28 + $0x80] sm:$0xfe]  ;;  %v3059_v17 = vld [vmem:[%s4058_s28 + $0x98] sm:$0xfe] }
 0x1bb   : > { %3493 = vmatpush3.bf16.msra.mxu0 %v3815_v13  ;;  %3366 = vmatprep.subr.bf16.mxu1 %v3816_v18  ;;  %v3058_v13 = vld [vmem:[%s4058_s28 + $0x88] sm:$0x1]  ;;  %v2480_v26 = vrot.slane %v3059_v17, 1 }
 0x1bc   : > { %3494 = vmatprep.subr.bf16.mxu0 %v3817_v21  ;;  %3368 = vmatprep.mubr.bf16.mxu1 %v1374_v22  ;;  %v2477_v22 = vrot.slane %v3057_v10, 1  ;;  %v2478_v23 = vrot.slane %v3058_v13, 1 }
 0x1bd   : > { %3496 = vmatprep.mubr.bf16.mxu0 %v4065_v44  ;;  %v1381_v44 = vrot.slane %v2955_v32, 7  ;;  %v3070_v32 = vld [vmem:[%s4058_s28 + $0x118] sm:$0x1] }
 0x1be   : > { %3367 = vmatpush3.bf16.msra.mxu1 %v3816_v18  ;;  %v3060_v18 = vld [vmem:[%s4058_s28 + $0xa0] sm:$0x1]  ;;  %v2479_v29 = vsel %vm1125_vm3, %v2477_v22, %v2478_v23  ;;  %v2496_v36 = vrot.slane %v3070_v32, 1 }
 0x1bf   : > { %3495 = vmatpush3.bf16.msra.mxu0 %v3817_v21  ;;  %3546 = vmatprep.subr.bf16.mxu1 %v3818_v27  ;;  %v2490_v21 = vrot.slane %v3066_v12, 1 }
 0x1c0   : > { %3512 = vmatprep.subr.bf16.mxu0 %v3818_v27 }
 0x1c1   : > { %3369 = vmatmul.mubr.bf16.vlgmr.msra.gmra.mrb[0].mxu1 %v1377_v30  ;;  %v2491_v28 = vsel %vm1125_vm3, %v2489_v20, %v2490_v21  ;;  %v2494_v30 = vsel %vm1125_vm3, %v2492_v24, %v2493_v25 }
 0x1c2   : > { %3497 = vmatmul.mubr.bf16.vlgmr.msra.gmra.mrb[0].mxu0 %v4069_v47  ;;  %3554 = vmatpush3.bf16.msra.mxu1 %v3818_v27  ;;  %v1383_v47 = vsel %vm729_vm2, %v1381_v44, %v1382_v35  ;;  %v3062_v44 = vld [vmem:[%s4058_s28 + $0xb8] sm:$0x1] }
 0x1c3   : > { %3513 = vmatpush3.bf16.msra.mxu0 %v3818_v27  ;;  %3547 = vmatprep.subr.bf16.mxu1 %v3819_v31  ;;  %v2481_v27 = vrot.slane %v3060_v18, 1 }
 0x1c4   : > { %3514 = vmatprep.subr.bf16.mxu0 %v3819_v31  ;;  %3372 = vmatprep.mubr.bf16.mxu1 %v1380_v34  ;;  %v3061_v34 = vld [vmem:[%s4058_s28 + $0xb0] sm:$0xfe] }
 0x1c5   : > { %3500 = vmatprep.mubr.bf16.mxu0 %v4073_v50  ;;  %v1387_v50 = vrot.slane %v2959_v42, 7  ;;  %v2482_v33 = vsel %vm1125_vm3, %v2480_v26, %v2481_v27  ;;  %v2483_v37 = vrot.slane %v3061_v34, 1 }
 0x1c6   : > { %3555 = vmatpush3.bf16.msra.mxu1 %v3819_v31 }
 0x1c7   : > { %3515 = vmatpush3.bf16.msra.mxu0 %v3819_v31  ;;  %3548 = vmatprep.subr.bf16.mxu1 %v3820_v38  ;;  %v3069_v31 = vld [vmem:[%s4058_s28 + $0x110] sm:$0xfe] }
 0x1c8   : > { %3516 = vmatprep.subr.bf16.mxu0 %v3820_v38  ;;  %v2495_v35 = vrot.slane %v3069_v31, 1 }
 0x1c9   : > { %3373 = vmatmul.mubr.bf16.gmra.mrb[4].mxu1 %v1383_v47 }
 0x1ca   : > { %3501 = vmatmul.mubr.bf16.gmra.mrb[4].mxu0 %v4078_v53  ;;  %3556 = vmatpush3.bf16.msra.mxu1 %v3820_v38  ;;  %v1389_v53 = vsel %vm729_vm2, %v1387_v50, %v1388_v46  ;;  %v2497_v39 = vsel %vm1125_vm3, %v2495_v35, %v2496_v36 }
 0x1cb   : > { %3517 = vmatpush3.bf16.msra.mxu0 %v3820_v38  ;;  %3549 = vmatprep.subr.bf16.mxu1 %v3821_v41  ;;  %v2484_v38 = vrot.slane %v3062_v44, 1 }
 0x1cc   : > { %3518 = vmatprep.subr.bf16.mxu0 %v3821_v41  ;;  %3376 = vmatprep.mubr.bf16.mxu1 %v1386_v45 }
 0x1cd   : > { %3504 = vmatprep.mubr.bf16.mxu0 %v4083_v56  ;;  %v1393_v56 = vrot.slane %v2963_v57, 7  ;;  %v2485_v40 = vsel %vm1125_vm3, %v2483_v37, %v2484_v38 }
 0x1ce   : > { %3557 = vmatpush3.bf16.msra.mxu1 %v3821_v41 }
 0x1cf   : > { %3519 = vmatpush3.bf16.msra.mxu0 %v3821_v41  ;;  %3550 = vmatprep.subr.bf16.mxu1 %v3822_v51  ;;  %v1395_v5 = vsel %vm729_vm2, %v1393_v56, %v1394_v61 }
 0x1d0   : > { %3520 = vmatprep.subr.bf16.mxu0 %v3822_v51 }
 0x1d1   : > { %3377 = vmatmul.mubr.bf16.gmra.mrb[8].mxu1 %v1389_v53 }
 0x1d2   : > { %3505 = vmatmul.mubr.bf16.gmra.mrb[8].mxu0 %v4092_v63  ;;  %3558 = vmatpush3.bf16.msra.mxu1 %v3822_v51  ;;  %v2474_v63 = vrot.slane %v3055_v62, 1 }
 0x1d3   : > { %3521 = vmatpush3.bf16.msra.mxu0 %v3822_v51  ;;  %3551 = vmatprep.subr.bf16.mxu1 %v3823_v55 }
 0x1d4   : > { %3522 = vmatprep.subr.bf16.mxu0 %v3823_v55  ;;  %3380 = vmatprep.mubr.bf16.mxu1 %v1392_v59  ;;  %v2476_v16 = vsel %vm1125_vm3, %v2474_v63, %v2475_v4 }
 0x1d5   : > { %3508 = vmatprep.mubr.bf16.mxu0 %v3045_v60 }
 0x1d6   : > { %3559 = vmatpush3.bf16.msra.mxu1 %v3823_v55 }
 0x1d7   : > { %3523 = vmatpush3.bf16.msra.mxu0 %v3823_v55  ;;  %3552 = vmatprep.subr.bf16.mxu1 %v3824_v1 }
 0x1d8   : > { %3524 = vmatprep.subr.bf16.mxu0 %v3824_v1 }
 0x1d9   : > { %3381 = vmatmul.mubr.bf16.gmra.mrb[12].mxu1 %v1395_v5 }
 0x1da   : > { %3509 = vmatmul.mubr.bf16.gmra.mrb[12].mxu0 %v3046_v6  ;;  %3560 = vmatpush3.bf16.msra.mxu1 %v3824_v1 }
 0x1db   : > { %3525 = vmatpush3.bf16.msra.mxu0 %v3824_v1  ;;  %3553 = vmatprep.subr.bf16.mxu1 %v3825_v7 }
 0x1dc   : > { %3526 = vmatprep.subr.bf16.mxu0 %v3825_v7  ;;  %3528 = vmatprep.mubr.bf16.mxu0 %v2476_v16 }
 0x1dd   : > { %3536 = vmatprep.mubr.bf16.mxu1 %v2488_v19 }
 0x1de   : > { %3561 = vmatpush3.bf16.msra.mxu1 %v3825_v7 }
 0x1df   : > { %3527 = vmatpush3.bf16.msra.mxu0 %v3825_v7 }
 0x1e1   : > { %3537 = vmatmul.mubr.bf16.vlgmr.msra.gmra.mrb[16].mxu1 %v2491_v28 }
 0x1e2   : > { %3529 = vmatmul.mubr.bf16.vlgmr.msra.gmra.mrb[0].mxu0 %v2479_v29  ;;  %3540 = vmatprep.mubr.bf16.mxu1 %v2494_v30 }
 0x1e3   : > { %3532 = vmatprep.mubr.bf16.mxu0 %v2482_v33 }
 0x1e9   : > { %3541 = vmatmul.mubr.bf16.gmra.mrb[20].mxu1 %v2497_v39 }
 0x1ea   : > { %3533 = vmatmul.mubr.bf16.gmra.mrb[4].mxu0 %v2485_v40 }
 0x294   : > { %v3370_v47 = vpop.f32.mrb[0].mxu1 }
 0x295   : > { %v1503_v41 = vpop.f32.mrb[1].mxu1 }
 0x296   : > { %v3371_v42 = vpop.f32.mrb[2].mxu1 }
 0x297   : > { %v1506_v43 = vpop.f32.mrb[3].mxu1 }
 0x29c   : > { %v4244_v45 = vpop.f32.mrb[4].mxu1 }
 0x29d   : > { %v4246_v50 = vpop.f32.mrb[5].mxu1 }
 0x29e   : > { %v4248_v46 = vpop.f32.mrb[6].mxu1 }
 0x29f   : > { %v4250_v48 = vpop.f32.mrb[7].mxu1 }
 0x2a4   : > { %v3378_v49 = vpop.f32.mrb[8].mxu1 }
 0x2a5   : > { %v3506_v51 = vpop.f32.mrb[8].mxu0  ;;  %v1535_v52 = vpop.f32.mrb[9].mxu1 }
 0x2a6   : > { %v3570_v54 = vadd.f32 %v3506_v51, %v3378_v49  ;;  %v2395_v53 = vpop.f32.mrb[9].mxu0  ;;  %v3379_v55 = vpop.f32.mrb[10].mxu1 }
 0x2a7   : > { %v3572_v57 = vadd.f32 %v2395_v53, %v1535_v52  ;;  %v3507_v58 = vpop.f32.mrb[10].mxu0  ;;  %v1538_v59 = vpop.f32.mrb[11].mxu1 }
 0x2a8   : > { %v3574_v60 = vadd.f32 %v3507_v58, %v3379_v55  ;;  %v2398_v56 = vpop.f32.mrb[11].mxu0 }
 0x2a9   : > { %v3576_v61 = vadd.f32 %v2398_v56, %v1538_v59 }
 0x2ac   : > { %v3382_v62 = vpop.f32.mrb[12].mxu1 }
 0x2ad   : > { %v3510_v0 = vpop.f32.mrb[12].mxu0  ;;  %v1551_v1 = vpop.f32.mrb[13].mxu1 }
 0x2ae   : > { %v3578_v2 = vadd.f32 %v3510_v0, %v3382_v62  ;;  %v2411_v3 = vpop.f32.mrb[13].mxu0  ;;  %v3383_v63 = vpop.f32.mrb[14].mxu1 }
 0x2af   : > { %v3580_v4 = vadd.f32 %v2411_v3, %v1551_v1  ;;  %v3511_v5 = vpop.f32.mrb[14].mxu0  ;;  %v1554_v6 = vpop.f32.mrb[15].mxu1 }
 0x2b0   : > { %v3582_v7 = vadd.f32 %v3511_v5, %v3383_v63  ;;  %v2414_v8 = vpop.f32.mrb[15].mxu0 }
 0x2b1   : > { %v3584_v9 = vadd.f32 %v2414_v8, %v1554_v6 }
 0x2b4   : > { %v3538_v10 = vpop.f32.mrb[16].mxu1 }
 0x2b5   : > { %v3530_v11 = vpop.f32.mrb[0].mxu0  ;;  %v3571_v12 = vadd.f32 %v3570_v54, %v3538_v10  ;;  %v2637_v13 = vpop.f32.mrb[17].mxu1 }
 0x2b6   : > { %v3562_v14 = vadd.f32 %v3530_v11, %v3370_v47  ;;  %v2605_v15 = vpop.f32.mrb[1].mxu0  ;;  %v3573_v16 = vadd.f32 %v3572_v57, %v2637_v13  ;;  %v3539_v17 = vpop.f32.mrb[18].mxu1 }
 0x2b7   : > { %v2694_v18 = vmax.f32 %v3571_v12, 0.0  ;;  %v3563_v19 = vadd.f32 %v2605_v15, %v1503_v41  ;;  %v3531_v20 = vpop.f32.mrb[2].mxu0  ;;  %v3575_v21 = vadd.f32 %v3574_v60, %v3539_v17  ;;  %v2640_v22 = vpop.f32.mrb[19].mxu1 }
 0x2b8   : > { %v2686_v23 = vmax.f32 %v3562_v14, 0.0  ;;  %v2692_v24 = vmax.f32 %v3573_v16, 0.0  ;;  %v3564_v25 = vadd.f32 %v3531_v20, %v3371_v42  ;;  %v2608_v26 = vpop.f32.mrb[3].mxu0  ;;  %v3577_v27 = vadd.f32 %v3576_v61, %v2640_v22 }
 0x2b9   : > { %2711 = vst.msk [vmem:[%s4023_s19 + $0x50] sm:$0xff] %vm2700_vm4, %v2694_v18  ;;  %v2684_v28 = vmax.f32 %v3563_v19, 0.0  ;;  %v2695_v29 = vmax.f32 %v3575_v21, 0.0  ;;  %v3565_v30 = vadd.f32 %v2608_v26, %v1506_v43 }
 0x2ba   : > { %2703 = vst.msk [vmem:[%s4023_s19 + $0x10] sm:$0xff] %vm2700_vm4, %v2686_v23  ;;  %2709 = vst.msk [vmem:[%s4023_s19 + $0x40] sm:$0xff] %vm2700_vm4, %v2692_v24  ;;  %v2687_v31 = vmax.f32 %v3564_v25, 0.0  ;;  %v2693_v32 = vmax.f32 %v3577_v27, 0.0 }
 0x2bb   : > { %2701 = vst.msk [vmem:[%s4023_s19] sm:$0xff] %vm2700_vm4, %v2684_v28  ;;  %2712 = vst.msk [vmem:[%s4023_s19 + $0x58] sm:$0xff] %vm2700_vm4, %v2695_v29  ;;  %v2685_v33 = vmax.f32 %v3565_v30, 0.0 }
 0x2bc   : > { %2704 = vst.msk [vmem:[%s4023_s19 + $0x18] sm:$0xff] %vm2700_vm4, %v2687_v31  ;;  %2710 = vst.msk [vmem:[%s4023_s19 + $0x48] sm:$0xff] %vm2700_vm4, %v2693_v32  ;;  %v3542_v34 = vpop.f32.mrb[20].mxu1 }
 0x2bd   : > { %2702 = vst.msk [vmem:[%s4023_s19 + $0x8] sm:$0xff] %vm2700_vm4, %v2685_v33  ;;  %v3534_v44 = vpop.f32.mrb[4].mxu0  ;;  %v3579_v35 = vadd.f32 %v3578_v2, %v3542_v34  ;;  %v2653_v36 = vpop.f32.mrb[21].mxu1 }
 0x2be   : > { %v3566_v37 = vadd.f32 %v3534_v44, %v4244_v45  ;;  %v2621_v38 = vpop.f32.mrb[5].mxu0  ;;  %v3581_v39 = vadd.f32 %v3580_v4, %v2653_v36  ;;  %v3543_v40 = vpop.f32.mrb[22].mxu1 }
 0x2bf   : > { %v2698_v47 = vmax.f32 %v3579_v35, 0.0  ;;  %v3567_v41 = vadd.f32 %v2621_v38, %v4246_v50  ;;  %v3535_v42 = vpop.f32.mrb[6].mxu0  ;;  %v3583_v43 = vadd.f32 %v3582_v7, %v3543_v40  ;;  %v2656_v49 = vpop.f32.mrb[23].mxu1 }
 0x2c0   : > { %v2690_v51 = vmax.f32 %v3566_v37, 0.0  ;;  %v2696_v52 = vmax.f32 %v3581_v39, 0.0  ;;  %v3568_v54 = vadd.f32 %v3535_v42, %v4248_v46  ;;  %v2624_v45 = vpop.f32.mrb[7].mxu0  ;;  %v3585_v53 = vadd.f32 %v3584_v9, %v2656_v49 }
 0x2c1   : > { %2715 = vst.msk [vmem:[%s4023_s19 + $0x70] sm:$0xff] %vm2700_vm4, %v2698_v47  ;;  %v2688_v55 = vmax.f32 %v3567_v41, 0.0  ;;  %v2699_v57 = vmax.f32 %v3583_v43, 0.0  ;;  %v3569_v50 = vadd.f32 %v2624_v45, %v4250_v48 }
 0x2c2   : > { %2707 = vst.msk [vmem:[%s4023_s19 + $0x30] sm:$0xff] %vm2700_vm4, %v2690_v51  ;;  %2713 = vst.msk [vmem:[%s4023_s19 + $0x60] sm:$0xff] %vm2700_vm4, %v2696_v52  ;;  %v2691_v58 = vmax.f32 %v3568_v54, 0.0  ;;  %v2697_v59 = vmax.f32 %v3585_v53, 0.0 }
 0x2c3   : > { %2705 = vst.msk [vmem:[%s4023_s19 + $0x20] sm:$0xff] %vm2700_vm4, %v2688_v55  ;;  %2716 = vst.msk [vmem:[%s4023_s19 + $0x78] sm:$0xff] %vm2700_vm4, %v2699_v57  ;;  %v2689_v46 = vmax.f32 %v3569_v50, 0.0 }
 0x2c4   : > { %2708 = vst.msk [vmem:[%s4023_s19 + $0x38] sm:$0xff] %vm2700_vm4, %v2691_v58  ;;  %2714 = vst.msk [vmem:[%s4023_s19 + $0x68] sm:$0xff] %vm2700_vm4, %v2697_v59 }
 0x2c5   : > { %2706 = vst.msk [vmem:[%s4023_s19 + $0x28] sm:$0xff] %vm2700_vm4, %v2689_v46 }
 0x2c6 PF: > { %s17_s21 = sadd.s32 1, %s3896_s21   ;;  %s4317_s18 = smov %s3888_s0 }
 0x2c7   : > { %p14_p2 = scmp.ge.s32.totalorder %s17_s21, 8   ;;  %s4318_s19 = smov %s3892_s20 }
 0x2c8   : > { %s4319_s0 = smov %s4322_s23  ;;  %s4320_s20 = smov %s4326_s24 }
 0x2c9   :  { %16 = sbr.rel (!%p14_p2) target bundleno = 3 (0x3), region = 104 }
 0x2d0   :  { %2758 = vsyncpa [#allocation7], 1 }
 0x2d1   :  { %2760 = vsyncpa [#allocation7 + $0x1], 1 }

</bundles_post_ra>
